<compile_context>
chip_gen: v6e
topology: v6e:2x2x1
jax: 0.10.0
libtpu: 0.0.40
codegen_flags: <defaults>
</compile_context>

<pallas_src>
import jax
import jax.numpy as jnp
from jax import lax
from jax.experimental import pallas as pl
from jax.experimental.pallas import tpu as pltpu


# ----------------------------- fused Pallas kernel ---------------------------

def _make_fused_kernel(num_layers, seq_len, batch, hidden_size, output_size):
    """Build a fused [L x LSTM layers + Linear-on-last-step] kernel."""
    T, B, H, L = seq_len, batch, hidden_size, num_layers
    G = 4 * H  # fused gate width (exactly one 128-lane vreg at H=32)

    def kernel(*refs):
        # ---- unpack refs ------------------------------------------------------
        x_ref = refs[0]                                   # (T*B, D_in) bf16, time-major
        lstm_refs = refs[1:1 + 3 * L]                     # per layer: wih, whh (bf16), b (f32)
        wlin_ref, blin_ref, h0_ref, c0_ref, out_ref = refs[1 + 3 * L:]

        # ---- hoisted per-lane affine: tanh(x) = 2*sigmoid(2x) - 1 on g lanes ---
        # (the *2 pre-scale of the g lanes is already folded into weights/bias)
        lane = lax.broadcasted_iota(jnp.int32, (1, G), 1)
        is_g = jnp.logical_and(lane >= 2 * H, lane < 3 * H)
        a_vec = jnp.broadcast_to(jnp.where(is_g, 2.0, 1.0).astype(jnp.float32), (B, G))
        b_vec = jnp.broadcast_to(jnp.where(is_g, -1.0, 0.0).astype(jnp.float32), (B, G))

        # ---- hoisted weight / bias loads (once per layer, not per timestep) ----
        wih = [lstm_refs[3 * l + 0][...] for l in range(L)]   # l=0: (D,G); l>0: (G,G) padded
        whh = [lstm_refs[3 * l + 1][...] for l in range(L)]   # (G,G) padded, rows [3H:4H) live
        b_raw = [lstm_refs[3 * l + 2][...] for l in range(L)] # (1,G) f32
        bias = [None] + [jnp.broadcast_to(b_raw[l], (B, G)) for l in range(1, L)]

        # ---- layer-0 input projection hoisted off the recurrence ---------------
        # one (T*B, D) x (D, G) MXU matmul instead of T tiny ones.
        gx0 = jnp.dot(x_ref[...], wih[0], preferred_element_type=jnp.float32) + b_raw[0]

        # ---- per-layer state, full 128-lane layout ------------------------------
        # real h / c sit in lanes [3H:4H); other lanes carry bounded junk that the
        # zero rows of the padded weights annihilate.
        h_bf = [h0_ref[l] for l in range(L)]               # (B,G) bf16
        c = [c0_ref[l] for l in range(L)]                  # (B,G) f32

        # ---- wavefront schedule: layer l step t right after layer l-1 step t ---
        # (deepest layer first within a wavefront step, so it reads the previous
        # layer's step-t hidden state before that layer advances to t+1).
        for s in range(T + L - 1):
            for layer in reversed(range(L)):
                t = s - layer
                if t < 0 or t >= T:
                    continue
                if layer == 0:
                    gin = gx0[t * B:(t + 1) * B, :]
                else:
                    gin = jnp.dot(h_bf[layer - 1], wih[layer],
                                  preferred_element_type=jnp.float32) + bias[layer]
                gates = gin + jnp.dot(h_bf[layer], whh[layer],
                                      preferred_element_type=jnp.float32)       # (B,G) f32
                # single full-vreg sigmoid pass; affine turns the g lanes into tanh
                acts = a_vec * jax.nn.sigmoid(gates) + b_vec
                # full-width state update: rolls (XLU) align f, i, g with the
                # o-lane block; no 32-lane extracts on the dependent chain.
                c[layer] = (pltpu.roll(acts, 2 * H, 1) * c[layer]
                            + pltpu.roll(acts, 3 * H, 1) * pltpu.roll(acts, H, 1))
                h_bf[layer] = (acts * jnp.tanh(c[layer])).astype(jnp.bfloat16)

        # ---- fused final Linear on the last timestep of the top layer ----------
        # (predict = linear(output)[:, -1, :]); W_lin is padded the same way, so
        # the full-width h feeds the MXU with no narrowing.
        out_ref[...] = (jnp.dot(h_bf[L - 1], wlin_ref[...],
                                preferred_element_type=jnp.float32) + blin_ref[...])

    return kernel


# ----------------------------- wrapper ---------------------------------------

@jax.jit
def net_forward(x, kparams, h0, c0):
    """Equivalent of Net.forward: x (B, T, D) -> predict (B, output_size)."""
    B, T, D = x.shape
    L = len(kparams["lstm"])
    H = h0.shape[-1]
    out_size = kparams["linear"]["b"].shape[-1]

    # time-major flatten + bf16 cast in the wrapper (halves the x DMA bytes and
    # removes the in-kernel prologue cast).
    x_flat = jnp.transpose(x, (1, 0, 2)).reshape(T * B, D).astype(jnp.bfloat16)

    # full-width (4H-lane) initial state; only lanes [3H:4H) are read through the
    # zero-padded weights, so replicating is safe and free (done once in XLA).
    h0_4 = jnp.tile(h0, (1, 1, 4)).astype(jnp.bfloat16)
    c0_4 = jnp.tile(c0, (1, 1, 4)).astype(jnp.float32)

    kernel = _make_fused_kernel(L, T, B, H, out_size)
    vmem = pl.BlockSpec(memory_space=pltpu.MemorySpace.VMEM)

    args = [x_flat]
    for p in kparams["lstm"]:
        args.extend([p["wih"], p["whh"], p["b"]])
    args.extend([kparams["linear"]["w"], kparams["linear"]["b"], h0_4, c0_4])

    return pl.pallas_call(
        kernel,
        out_shape=jax.ShapeDtypeStruct((B, out_size), jnp.float32),
        in_specs=[vmem] * len(args),
        out_specs=vmem,
    )(*args)


def init_params(key, input_size, hidden_size, num_layers, output_size):
    """Deterministic init mirroring nn.LSTM / nn.Linear shapes, pre-packed for
    the kernel: weights pre-transposed, tanh-gate columns pre-scaled by 2
    (single-sigmoid trick), recurrent/input/linear weights zero-padded to read
    the full-width (B,4H) hidden state (real h in rows [3H:4H)), bf16 MXU
    operands, f32 fused bias (b_ih + b_hh)."""
    H = hidden_size
    G = 4 * H
    params = {"lstm": [], "linear": {}}
    bound = 1.0 / (H ** 0.5)

    def scale_g_cols(w_t):  # w_t: (d, 4H) — pre-scale tanh-gate columns by 2
        return w_t.at[:, 2 * H:3 * H].multiply(2.0)

    for layer in range(num_layers):
        d_in = input_size if layer == 0 else H
        key, k1, k2, k3, k4 = jax.random.split(key, 5)
        w_ih = jax.random.uniform(k1, (G, d_in), jnp.float32, -bound, bound)
        w_hh = jax.random.uniform(k2, (G, H), jnp.float32, -bound, bound)
        b_ih = jax.random.uniform(k3, (G,), jnp.float32, -bound, bound)
        b_hh = jax.random.uniform(k4, (G,), jnp.float32, -bound, bound)

        wih_t = scale_g_cols(w_ih.T)                              # (d_in, G)
        whh_t = scale_g_cols(w_hh.T)                              # (H,    G)
        b = scale_g_cols((b_ih + b_hh).reshape(1, G))             # (1,    G)

        if layer > 0:
            # layers >= 1 consume the previous layer's full-width h: pad with
            # zero rows so the junk lanes contribute nothing.
            wih_p = jnp.zeros((G, G), jnp.float32).at[3 * H:, :].set(wih_t)
        else:
            wih_p = wih_t
        whh_p = jnp.zeros((G, G), jnp.float32).at[3 * H:, :].set(whh_t)

        params["lstm"].append({
            "wih": wih_p.astype(jnp.bfloat16),
            "whh": whh_p.astype(jnp.bfloat16),
            "b": b,
        })

    key, k1, k2 = jax.random.split(key, 3)
    lb = 1.0 / (H ** 0.5)
    w = jax.random.uniform(k1, (output_size, H), jnp.float32, -lb, lb)
    b = jax.random.uniform(k2, (output_size,), jnp.float32, -lb, lb)
    w_p = jnp.zeros((G, output_size), jnp.float32).at[3 * H:, :].set(w.T)
    params["linear"] = {"w": w_p.astype(jnp.bfloat16),
                        "b": b.reshape(1, output_size)}
    return params, key


# ----------------------------- main -------------------------------------------

if __name__ == "__main__":
    # Small config consistent with the module's constructor arguments.
    batch_size = 2
    seq_length = 8
    input_size = 16
    hidden_size = 32
    num_layers = 2
    output_size = 4

    key = jax.random.PRNGKey(0)
    params, key = init_params(key, input_size, hidden_size, num_layers, output_size)

    key, kx, kh, kc = jax.random.split(key, 4)
    x = jax.random.normal(kx, (batch_size, seq_length, input_size), jnp.float32)
    # Net.forward draws fresh randn h_0 / c_0 each call; here: deterministic normal.
    h0 = jax.random.normal(kh, (num_layers, batch_size, hidden_size), jnp.float32)
    c0 = jax.random.normal(kc, (num_layers, batch_size, hidden_size), jnp.float32)

    # TODO(synk): nn.LSTM inter-layer dropout is train-mode only; omitted (eval semantics).
    predict = net_forward(x, params, h0, c0)
    jax.block_until_ready(predict)
    assert predict.shape == (batch_size, output_size)
    print("KERNEL_OK")
</pallas_src>

<mosaic_0001>
module attributes {stable_mosaic.version = 11 : i64} {
  func.func @kernel(%arg0: memref<16x16xbf16, #tpu.memory_space<vmem>>, %arg1: memref<16x128xbf16, #tpu.memory_space<vmem>>, %arg2: memref<128x128xbf16, #tpu.memory_space<vmem>>, %arg3: memref<1x128xf32, #tpu.memory_space<vmem>>, %arg4: memref<128x128xbf16, #tpu.memory_space<vmem>>, %arg5: memref<128x128xbf16, #tpu.memory_space<vmem>>, %arg6: memref<1x128xf32, #tpu.memory_space<vmem>>, %arg7: memref<128x4xbf16, #tpu.memory_space<vmem>>, %arg8: memref<1x4xf32, #tpu.memory_space<vmem>>, %arg9: memref<2x2x128xbf16, #tpu.memory_space<vmem>>, %arg10: memref<2x2x128xf32, #tpu.memory_space<vmem>>, %arg11: memref<2x4xf32, #tpu.memory_space<vmem>>) attributes {dimension_semantics = [], scalar_prefetch = 0 : i64, scratch_operands = 0 : i64, tpu.core_type = #tpu.core_type<tc>} {
    %0 = tpu.iota {dimensions = array<i32: 1>} : vector<1x128xi32>
    %c64_i32 = arith.constant 64 : i32
    %1 = vector.broadcast %c64_i32 : i32 to vector<1x128xi32>
    %2 = arith.cmpi sge, %0, %1 : vector<1x128xi32>
    %c96_i32 = arith.constant 96 : i32
    %3 = vector.broadcast %c96_i32 : i32 to vector<1x128xi32>
    %4 = arith.cmpi slt, %0, %3 : vector<1x128xi32>
    %5 = arith.andi %2, %4 : vector<1x128xi1>
    %cst = arith.constant 2.000000e+00 : f32
    %cst_0 = arith.constant 1.000000e+00 : f32
    %6 = vector.broadcast %cst : f32 to vector<1x128xf32>
    %7 = vector.broadcast %cst_0 : f32 to vector<1x128xf32>
    %8 = arith.select %5, %6, %7 : vector<1x128xi1>, vector<1x128xf32>
    %9 = vector.shape_cast %8 : vector<1x128xf32> to vector<1x128xf32>
    %10 = vector.broadcast %9 : vector<1x128xf32> to vector<2x128xf32>
    %cst_1 = arith.constant -1.000000e+00 : f32
    %cst_2 = arith.constant 0.000000e+00 : f32
    %11 = vector.broadcast %cst_1 : f32 to vector<1x128xf32>
    %12 = vector.broadcast %cst_2 : f32 to vector<1x128xf32>
    %13 = arith.select %5, %11, %12 : vector<1x128xi1>, vector<1x128xf32>
    %14 = vector.shape_cast %13 : vector<1x128xf32> to vector<1x128xf32>
    %15 = vector.broadcast %14 : vector<1x128xf32> to vector<2x128xf32>
    %c0 = arith.constant 0 : index
    %c0_3 = arith.constant 0 : index
    %16 = vector.load %arg1[%c0, %c0_3] : memref<16x128xbf16, #tpu.memory_space<vmem>>, vector<16x128xbf16>
    %c0_4 = arith.constant 0 : index
    %c0_5 = arith.constant 0 : index
    %17 = vector.load %arg4[%c0_4, %c0_5] : memref<128x128xbf16, #tpu.memory_space<vmem>>, vector<128x128xbf16>
    %c0_6 = arith.constant 0 : index
    %c0_7 = arith.constant 0 : index
    %18 = vector.load %arg2[%c0_6, %c0_7] : memref<128x128xbf16, #tpu.memory_space<vmem>>, vector<128x128xbf16>
    %c0_8 = arith.constant 0 : index
    %c0_9 = arith.constant 0 : index
    %19 = vector.load %arg5[%c0_8, %c0_9] : memref<128x128xbf16, #tpu.memory_space<vmem>>, vector<128x128xbf16>
    %c0_10 = arith.constant 0 : index
    %c0_11 = arith.constant 0 : index
    %20 = vector.load %arg3[%c0_10, %c0_11] : memref<1x128xf32, #tpu.memory_space<vmem>>, vector<1x128xf32>
    %c0_12 = arith.constant 0 : index
    %c0_13 = arith.constant 0 : index
    %21 = vector.load %arg6[%c0_12, %c0_13] : memref<1x128xf32, #tpu.memory_space<vmem>>, vector<1x128xf32>
    %22 = vector.shape_cast %21 : vector<1x128xf32> to vector<1x128xf32>
    %23 = vector.broadcast %22 : vector<1x128xf32> to vector<2x128xf32>
    %c0_14 = arith.constant 0 : index
    %c0_15 = arith.constant 0 : index
    %24 = vector.load %arg0[%c0_14, %c0_15] : memref<16x16xbf16, #tpu.memory_space<vmem>>, vector<16x16xbf16>
    %cst_16 = arith.constant dense<0.000000e+00> : vector<16x128xf32>
    %25 = tpu.matmul %24, %16, %cst_16 {dimension_numbers = #tpu.dot_dimension_numbers<[1], [0], [0], [1], [0, 0, 1, 1], [], []>} : vector<16x16xbf16>, vector<16x128xbf16>, vector<16x128xf32> -> vector<16x128xf32>
    %26 = vector.broadcast %20 : vector<1x128xf32> to vector<16x128xf32>
    %27 = arith.addf %25, %26 : vector<16x128xf32>
    %c0_17 = arith.constant 0 : index
    %c0_18 = arith.constant 0 : index
    %c0_19 = arith.constant 0 : index
    %28 = vector.load %arg9[%c0_17, %c0_18, %c0_19] : memref<2x2x128xbf16, #tpu.memory_space<vmem>>, vector<1x2x128xbf16>
    %29 = vector.shape_cast %28 : vector<1x2x128xbf16> to vector<2x128xbf16>
    %c1 = arith.constant 1 : index
    %c0_20 = arith.constant 0 : index
    %c0_21 = arith.constant 0 : index
    %30 = vector.load %arg9[%c1, %c0_20, %c0_21] : memref<2x2x128xbf16, #tpu.memory_space<vmem>>, vector<1x2x128xbf16>
    %31 = vector.shape_cast %30 : vector<1x2x128xbf16> to vector<2x128xbf16>
    %c0_22 = arith.constant 0 : index
    %c0_23 = arith.constant 0 : index
    %c0_24 = arith.constant 0 : index
    %32 = vector.load %arg10[%c0_22, %c0_23, %c0_24] : memref<2x2x128xf32, #tpu.memory_space<vmem>>, vector<1x2x128xf32>
    %33 = vector.shape_cast %32 : vector<1x2x128xf32> to vector<2x128xf32>
    %c1_25 = arith.constant 1 : index
    %c0_26 = arith.constant 0 : index
    %c0_27 = arith.constant 0 : index
    %34 = vector.load %arg10[%c1_25, %c0_26, %c0_27] : memref<2x2x128xf32, #tpu.memory_space<vmem>>, vector<1x2x128xf32>
    %35 = vector.shape_cast %34 : vector<1x2x128xf32> to vector<2x128xf32>
    %36 = vector.extract_strided_slice %27 {offsets = [0, 0], sizes = [2, 128], strides = [1, 1]} : vector<16x128xf32> to vector<2x128xf32>
    %cst_28 = arith.constant dense<0.000000e+00> : vector<2x128xf32>
    %37 = tpu.matmul %29, %18, %cst_28 {dimension_numbers = #tpu.dot_dimension_numbers<[1], [0], [0], [1], [0, 0, 1, 1], [], []>} : vector<2x128xbf16>, vector<128x128xbf16>, vector<2x128xf32> -> vector<2x128xf32>
    %38 = arith.addf %36, %37 : vector<2x128xf32>
    %39 = arith.negf %38 : vector<2x128xf32>
    %40 = math.exp %39 : vector<2x128xf32>
    %cst_29 = arith.constant 1.000000e+00 : f32
    %41 = vector.broadcast %cst_29 : f32 to vector<2x128xf32>
    %42 = arith.addf %41, %40 : vector<2x128xf32>
    %43 = arith.divf %41, %42 : vector<2x128xf32>
    %44 = arith.mulf %10, %43 : vector<2x128xf32>
    %45 = arith.addf %44, %15 : vector<2x128xf32>
    %c64_i32_30 = arith.constant 64 : i32
    %46 = tpu.dynamic_rotate %45 by %c64_i32_30 dim 1 : vector<2x128xf32>, i32 -> vector<2x128xf32>
    %47 = arith.mulf %46, %33 : vector<2x128xf32>
    %c96_i32_31 = arith.constant 96 : i32
    %48 = tpu.dynamic_rotate %45 by %c96_i32_31 dim 1 : vector<2x128xf32>, i32 -> vector<2x128xf32>
    %c32_i32 = arith.constant 32 : i32
    %49 = tpu.dynamic_rotate %45 by %c32_i32 dim 1 : vector<2x128xf32>, i32 -> vector<2x128xf32>
    %50 = arith.mulf %48, %49 : vector<2x128xf32>
    %51 = arith.addf %47, %50 : vector<2x128xf32>
    %52 = math.tanh %51 : vector<2x128xf32>
    %53 = arith.mulf %45, %52 : vector<2x128xf32>
    %54 = arith.truncf %53 : vector<2x128xf32> to vector<2x128xbf16>
    %cst_32 = arith.constant dense<0.000000e+00> : vector<2x128xf32>
    %55 = tpu.matmul %54, %17, %cst_32 {dimension_numbers = #tpu.dot_dimension_numbers<[1], [0], [0], [1], [0, 0, 1, 1], [], []>} : vector<2x128xbf16>, vector<128x128xbf16>, vector<2x128xf32> -> vector<2x128xf32>
    %56 = arith.addf %55, %23 : vector<2x128xf32>
    %cst_33 = arith.constant dense<0.000000e+00> : vector<2x128xf32>
    %57 = tpu.matmul %31, %19, %cst_33 {dimension_numbers = #tpu.dot_dimension_numbers<[1], [0], [0], [1], [0, 0, 1, 1], [], []>} : vector<2x128xbf16>, vector<128x128xbf16>, vector<2x128xf32> -> vector<2x128xf32>
    %58 = arith.addf %56, %57 : vector<2x128xf32>
    %59 = arith.negf %58 : vector<2x128xf32>
    %60 = math.exp %59 : vector<2x128xf32>
    %cst_34 = arith.constant 1.000000e+00 : f32
    %61 = vector.broadcast %cst_34 : f32 to vector<2x128xf32>
    %62 = arith.addf %61, %60 : vector<2x128xf32>
    %63 = arith.divf %61, %62 : vector<2x128xf32>
    %64 = arith.mulf %10, %63 : vector<2x128xf32>
    %65 = arith.addf %64, %15 : vector<2x128xf32>
    %c64_i32_35 = arith.constant 64 : i32
    %66 = tpu.dynamic_rotate %65 by %c64_i32_35 dim 1 : vector<2x128xf32>, i32 -> vector<2x128xf32>
    %67 = arith.mulf %66, %35 : vector<2x128xf32>
    %c96_i32_36 = arith.constant 96 : i32
    %68 = tpu.dynamic_rotate %65 by %c96_i32_36 dim 1 : vector<2x128xf32>, i32 -> vector<2x128xf32>
    %c32_i32_37 = arith.constant 32 : i32
    %69 = tpu.dynamic_rotate %65 by %c32_i32_37 dim 1 : vector<2x128xf32>, i32 -> vector<2x128xf32>
    %70 = arith.mulf %68, %69 : vector<2x128xf32>
    %71 = arith.addf %67, %70 : vector<2x128xf32>
    %72 = math.tanh %71 : vector<2x128xf32>
    %73 = arith.mulf %65, %72 : vector<2x128xf32>
    %74 = arith.truncf %73 : vector<2x128xf32> to vector<2x128xbf16>
    %75 = vector.extract_strided_slice %27 {offsets = [2, 0], sizes = [2, 128], strides = [1, 1]} : vector<16x128xf32> to vector<2x128xf32>
    %cst_38 = arith.constant dense<0.000000e+00> : vector<2x128xf32>
    %76 = tpu.matmul %54, %18, %cst_38 {dimension_numbers = #tpu.dot_dimension_numbers<[1], [0], [0], [1], [0, 0, 1, 1], [], []>} : vector<2x128xbf16>, vector<128x128xbf16>, vector<2x128xf32> -> vector<2x128xf32>
    %77 = arith.addf %75, %76 : vector<2x128xf32>
    %78 = arith.negf %77 : vector<2x128xf32>
    %79 = math.exp %78 : vector<2x128xf32>
    %cst_39 = arith.constant 1.000000e+00 : f32
    %80 = vector.broadcast %cst_39 : f32 to vector<2x128xf32>
    %81 = arith.addf %80, %79 : vector<2x128xf32>
    %82 = arith.divf %80, %81 : vector<2x128xf32>
    %83 = arith.mulf %10, %82 : vector<2x128xf32>
    %84 = arith.addf %83, %15 : vector<2x128xf32>
    %c64_i32_40 = arith.constant 64 : i32
    %85 = tpu.dynamic_rotate %84 by %c64_i32_40 dim 1 : vector<2x128xf32>, i32 -> vector<2x128xf32>
    %86 = arith.mulf %85, %51 : vector<2x128xf32>
    %c96_i32_41 = arith.constant 96 : i32
    %87 = tpu.dynamic_rotate %84 by %c96_i32_41 dim 1 : vector<2x128xf32>, i32 -> vector<2x128xf32>
    %c32_i32_42 = arith.constant 32 : i32
    %88 = tpu.dynamic_rotate %84 by %c32_i32_42 dim 1 : vector<2x128xf32>, i32 -> vector<2x128xf32>
    %89 = arith.mulf %87, %88 : vector<2x128xf32>
    %90 = arith.addf %86, %89 : vector<2x128xf32>
    %91 = math.tanh %90 : vector<2x128xf32>
    %92 = arith.mulf %84, %91 : vector<2x128xf32>
    %93 = arith.truncf %92 : vector<2x128xf32> to vector<2x128xbf16>
    %cst_43 = arith.constant dense<0.000000e+00> : vector<2x128xf32>
    %94 = tpu.matmul %93, %17, %cst_43 {dimension_numbers = #tpu.dot_dimension_numbers<[1], [0], [0], [1], [0, 0, 1, 1], [], []>} : vector<2x128xbf16>, vector<128x128xbf16>, vector<2x128xf32> -> vector<2x128xf32>
    %95 = arith.addf %94, %23 : vector<2x128xf32>
    %cst_44 = arith.constant dense<0.000000e+00> : vector<2x128xf32>
    %96 = tpu.matmul %74, %19, %cst_44 {dimension_numbers = #tpu.dot_dimension_numbers<[1], [0], [0], [1], [0, 0, 1, 1], [], []>} : vector<2x128xbf16>, vector<128x128xbf16>, vector<2x128xf32> -> vector<2x128xf32>
    %97 = arith.addf %95, %96 : vector<2x128xf32>
    %98 = arith.negf %97 : vector<2x128xf32>
    %99 = math.exp %98 : vector<2x128xf32>
    %cst_45 = arith.constant 1.000000e+00 : f32
    %100 = vector.broadcast %cst_45 : f32 to vector<2x128xf32>
    %101 = arith.addf %100, %99 : vector<2x128xf32>
    %102 = arith.divf %100, %101 : vector<2x128xf32>
    %103 = arith.mulf %10, %102 : vector<2x128xf32>
    %104 = arith.addf %103, %15 : vector<2x128xf32>
    %c64_i32_46 = arith.constant 64 : i32
    %105 = tpu.dynamic_rotate %104 by %c64_i32_46 dim 1 : vector<2x128xf32>, i32 -> vector<2x128xf32>
    %106 = arith.mulf %105, %71 : vector<2x128xf32>
    %c96_i32_47 = arith.constant 96 : i32
    %107 = tpu.dynamic_rotate %104 by %c96_i32_47 dim 1 : vector<2x128xf32>, i32 -> vector<2x128xf32>
    %c32_i32_48 = arith.constant 32 : i32
    %108 = tpu.dynamic_rotate %104 by %c32_i32_48 dim 1 : vector<2x128xf32>, i32 -> vector<2x128xf32>
    %109 = arith.mulf %107, %108 : vector<2x128xf32>
    %110 = arith.addf %106, %109 : vector<2x128xf32>
    %111 = math.tanh %110 : vector<2x128xf32>
    %112 = arith.mulf %104, %111 : vector<2x128xf32>
    %113 = arith.truncf %112 : vector<2x128xf32> to vector<2x128xbf16>
    %114 = vector.extract_strided_slice %27 {offsets = [4, 0], sizes = [2, 128], strides = [1, 1]} : vector<16x128xf32> to vector<2x128xf32>
    %cst_49 = arith.constant dense<0.000000e+00> : vector<2x128xf32>
    %115 = tpu.matmul %93, %18, %cst_49 {dimension_numbers = #tpu.dot_dimension_numbers<[1], [0], [0], [1], [0, 0, 1, 1], [], []>} : vector<2x128xbf16>, vector<128x128xbf16>, vector<2x128xf32> -> vector<2x128xf32>
    %116 = arith.addf %114, %115 : vector<2x128xf32>
    %117 = arith.negf %116 : vector<2x128xf32>
    %118 = math.exp %117 : vector<2x128xf32>
    %cst_50 = arith.constant 1.000000e+00 : f32
    %119 = vector.broadcast %cst_50 : f32 to vector<2x128xf32>
    %120 = arith.addf %119, %118 : vector<2x128xf32>
    %121 = arith.divf %119, %120 : vector<2x128xf32>
    %122 = arith.mulf %10, %121 : vector<2x128xf32>
    %123 = arith.addf %122, %15 : vector<2x128xf32>
    %c64_i32_51 = arith.constant 64 : i32
    %124 = tpu.dynamic_rotate %123 by %c64_i32_51 dim 1 : vector<2x128xf32>, i32 -> vector<2x128xf32>
    %125 = arith.mulf %124, %90 : vector<2x128xf32>
    %c96_i32_52 = arith.constant 96 : i32
    %126 = tpu.dynamic_rotate %123 by %c96_i32_52 dim 1 : vector<2x128xf32>, i32 -> vector<2x128xf32>
    %c32_i32_53 = arith.constant 32 : i32
    %127 = tpu.dynamic_rotate %123 by %c32_i32_53 dim 1 : vector<2x128xf32>, i32 -> vector<2x128xf32>
    %128 = arith.mulf %126, %127 : vector<2x128xf32>
    %129 = arith.addf %125, %128 : vector<2x128xf32>
    %130 = math.tanh %129 : vector<2x128xf32>
    %131 = arith.mulf %123, %130 : vector<2x128xf32>
    %132 = arith.truncf %131 : vector<2x128xf32> to vector<2x128xbf16>
    %cst_54 = arith.constant dense<0.000000e+00> : vector<2x128xf32>
    %133 = tpu.matmul %132, %17, %cst_54 {dimension_numbers = #tpu.dot_dimension_numbers<[1], [0], [0], [1], [0, 0, 1, 1], [], []>} : vector<2x128xbf16>, vector<128x128xbf16>, vector<2x128xf32> -> vector<2x128xf32>
    %134 = arith.addf %133, %23 : vector<2x128xf32>
    %cst_55 = arith.constant dense<0.000000e+00> : vector<2x128xf32>
    %135 = tpu.matmul %113, %19, %cst_55 {dimension_numbers = #tpu.dot_dimension_numbers<[1], [0], [0], [1], [0, 0, 1, 1], [], []>} : vector<2x128xbf16>, vector<128x128xbf16>, vector<2x128xf32> -> vector<2x128xf32>
    %136 = arith.addf %134, %135 : vector<2x128xf32>
    %137 = arith.negf %136 : vector<2x128xf32>
    %138 = math.exp %137 : vector<2x128xf32>
    %cst_56 = arith.constant 1.000000e+00 : f32
    %139 = vector.broadcast %cst_56 : f32 to vector<2x128xf32>
    %140 = arith.addf %139, %138 : vector<2x128xf32>
    %141 = arith.divf %139, %140 : vector<2x128xf32>
    %142 = arith.mulf %10, %141 : vector<2x128xf32>
    %143 = arith.addf %142, %15 : vector<2x128xf32>
    %c64_i32_57 = arith.constant 64 : i32
    %144 = tpu.dynamic_rotate %143 by %c64_i32_57 dim 1 : vector<2x128xf32>, i32 -> vector<2x128xf32>
    %145 = arith.mulf %144, %110 : vector<2x128xf32>
    %c96_i32_58 = arith.constant 96 : i32
    %146 = tpu.dynamic_rotate %143 by %c96_i32_58 dim 1 : vector<2x128xf32>, i32 -> vector<2x128xf32>
    %c32_i32_59 = arith.constant 32 : i32
    %147 = tpu.dynamic_rotate %143 by %c32_i32_59 dim 1 : vector<2x128xf32>, i32 -> vector<2x128xf32>
    %148 = arith.mulf %146, %147 : vector<2x128xf32>
    %149 = arith.addf %145, %148 : vector<2x128xf32>
    %150 = math.tanh %149 : vector<2x128xf32>
    %151 = arith.mulf %143, %150 : vector<2x128xf32>
    %152 = arith.truncf %151 : vector<2x128xf32> to vector<2x128xbf16>
    %153 = vector.extract_strided_slice %27 {offsets = [6, 0], sizes = [2, 128], strides = [1, 1]} : vector<16x128xf32> to vector<2x128xf32>
    %cst_60 = arith.constant dense<0.000000e+00> : vector<2x128xf32>
    %154 = tpu.matmul %132, %18, %cst_60 {dimension_numbers = #tpu.dot_dimension_numbers<[1], [0], [0], [1], [0, 0, 1, 1], [], []>} : vector<2x128xbf16>, vector<128x128xbf16>, vector<2x128xf32> -> vector<2x128xf32>
    %155 = arith.addf %153, %154 : vector<2x128xf32>
    %156 = arith.negf %155 : vector<2x128xf32>
    %157 = math.exp %156 : vector<2x128xf32>
    %cst_61 = arith.constant 1.000000e+00 : f32
    %158 = vector.broadcast %cst_61 : f32 to vector<2x128xf32>
    %159 = arith.addf %158, %157 : vector<2x128xf32>
    %160 = arith.divf %158, %159 : vector<2x128xf32>
    %161 = arith.mulf %10, %160 : vector<2x128xf32>
    %162 = arith.addf %161, %15 : vector<2x128xf32>
    %c64_i32_62 = arith.constant 64 : i32
    %163 = tpu.dynamic_rotate %162 by %c64_i32_62 dim 1 : vector<2x128xf32>, i32 -> vector<2x128xf32>
    %164 = arith.mulf %163, %129 : vector<2x128xf32>
    %c96_i32_63 = arith.constant 96 : i32
    %165 = tpu.dynamic_rotate %162 by %c96_i32_63 dim 1 : vector<2x128xf32>, i32 -> vector<2x128xf32>
    %c32_i32_64 = arith.constant 32 : i32
    %166 = tpu.dynamic_rotate %162 by %c32_i32_64 dim 1 : vector<2x128xf32>, i32 -> vector<2x128xf32>
    %167 = arith.mulf %165, %166 : vector<2x128xf32>
    %168 = arith.addf %164, %167 : vector<2x128xf32>
    %169 = math.tanh %168 : vector<2x128xf32>
    %170 = arith.mulf %162, %169 : vector<2x128xf32>
    %171 = arith.truncf %170 : vector<2x128xf32> to vector<2x128xbf16>
    %cst_65 = arith.constant dense<0.000000e+00> : vector<2x128xf32>
    %172 = tpu.matmul %171, %17, %cst_65 {dimension_numbers = #tpu.dot_dimension_numbers<[1], [0], [0], [1], [0, 0, 1, 1], [], []>} : vector<2x128xbf16>, vector<128x128xbf16>, vector<2x128xf32> -> vector<2x128xf32>
    %173 = arith.addf %172, %23 : vector<2x128xf32>
    %cst_66 = arith.constant dense<0.000000e+00> : vector<2x128xf32>
    %174 = tpu.matmul %152, %19, %cst_66 {dimension_numbers = #tpu.dot_dimension_numbers<[1], [0], [0], [1], [0, 0, 1, 1], [], []>} : vector<2x128xbf16>, vector<128x128xbf16>, vector<2x128xf32> -> vector<2x128xf32>
    %175 = arith.addf %173, %174 : vector<2x128xf32>
    %176 = arith.negf %175 : vector<2x128xf32>
    %177 = math.exp %176 : vector<2x128xf32>
    %cst_67 = arith.constant 1.000000e+00 : f32
    %178 = vector.broadcast %cst_67 : f32 to vector<2x128xf32>
    %179 = arith.addf %178, %177 : vector<2x128xf32>
    %180 = arith.divf %178, %179 : vector<2x128xf32>
    %181 = arith.mulf %10, %180 : vector<2x128xf32>
    %182 = arith.addf %181, %15 : vector<2x128xf32>
    %c64_i32_68 = arith.constant 64 : i32
    %183 = tpu.dynamic_rotate %182 by %c64_i32_68 dim 1 : vector<2x128xf32>, i32 -> vector<2x128xf32>
    %184 = arith.mulf %183, %149 : vector<2x128xf32>
    %c96_i32_69 = arith.constant 96 : i32
    %185 = tpu.dynamic_rotate %182 by %c96_i32_69 dim 1 : vector<2x128xf32>, i32 -> vector<2x128xf32>
    %c32_i32_70 = arith.constant 32 : i32
    %186 = tpu.dynamic_rotate %182 by %c32_i32_70 dim 1 : vector<2x128xf32>, i32 -> vector<2x128xf32>
    %187 = arith.mulf %185, %186 : vector<2x128xf32>
    %188 = arith.addf %184, %187 : vector<2x128xf32>
    %189 = math.tanh %188 : vector<2x128xf32>
    %190 = arith.mulf %182, %189 : vector<2x128xf32>
    %191 = arith.truncf %190 : vector<2x128xf32> to vector<2x128xbf16>
    %192 = vector.extract_strided_slice %27 {offsets = [8, 0], sizes = [2, 128], strides = [1, 1]} : vector<16x128xf32> to vector<2x128xf32>
    %cst_71 = arith.constant dense<0.000000e+00> : vector<2x128xf32>
    %193 = tpu.matmul %171, %18, %cst_71 {dimension_numbers = #tpu.dot_dimension_numbers<[1], [0], [0], [1], [0, 0, 1, 1], [], []>} : vector<2x128xbf16>, vector<128x128xbf16>, vector<2x128xf32> -> vector<2x128xf32>
    %194 = arith.addf %192, %193 : vector<2x128xf32>
    %195 = arith.negf %194 : vector<2x128xf32>
    %196 = math.exp %195 : vector<2x128xf32>
    %cst_72 = arith.constant 1.000000e+00 : f32
    %197 = vector.broadcast %cst_72 : f32 to vector<2x128xf32>
    %198 = arith.addf %197, %196 : vector<2x128xf32>
    %199 = arith.divf %197, %198 : vector<2x128xf32>
    %200 = arith.mulf %10, %199 : vector<2x128xf32>
    %201 = arith.addf %200, %15 : vector<2x128xf32>
    %c64_i32_73 = arith.constant 64 : i32
    %202 = tpu.dynamic_rotate %201 by %c64_i32_73 dim 1 : vector<2x128xf32>, i32 -> vector<2x128xf32>
    %203 = arith.mulf %202, %168 : vector<2x128xf32>
    %c96_i32_74 = arith.constant 96 : i32
    %204 = tpu.dynamic_rotate %201 by %c96_i32_74 dim 1 : vector<2x128xf32>, i32 -> vector<2x128xf32>
    %c32_i32_75 = arith.constant 32 : i32
    %205 = tpu.dynamic_rotate %201 by %c32_i32_75 dim 1 : vector<2x128xf32>, i32 -> vector<2x128xf32>
    %206 = arith.mulf %204, %205 : vector<2x128xf32>
    %207 = arith.addf %203, %206 : vector<2x128xf32>
    %208 = math.tanh %207 : vector<2x128xf32>
    %209 = arith.mulf %201, %208 : vector<2x128xf32>
    %210 = arith.truncf %209 : vector<2x128xf32> to vector<2x128xbf16>
    %cst_76 = arith.constant dense<0.000000e+00> : vector<2x128xf32>
    %211 = tpu.matmul %210, %17, %cst_76 {dimension_numbers = #tpu.dot_dimension_numbers<[1], [0], [0], [1], [0, 0, 1, 1], [], []>} : vector<2x128xbf16>, vector<128x128xbf16>, vector<2x128xf32> -> vector<2x128xf32>
    %212 = arith.addf %211, %23 : vector<2x128xf32>
    %cst_77 = arith.constant dense<0.000000e+00> : vector<2x128xf32>
    %213 = tpu.matmul %191, %19, %cst_77 {dimension_numbers = #tpu.dot_dimension_numbers<[1], [0], [0], [1], [0, 0, 1, 1], [], []>} : vector<2x128xbf16>, vector<128x128xbf16>, vector<2x128xf32> -> vector<2x128xf32>
    %214 = arith.addf %212, %213 : vector<2x128xf32>
    %215 = arith.negf %214 : vector<2x128xf32>
    %216 = math.exp %215 : vector<2x128xf32>
    %cst_78 = arith.constant 1.000000e+00 : f32
    %217 = vector.broadcast %cst_78 : f32 to vector<2x128xf32>
    %218 = arith.addf %217, %216 : vector<2x128xf32>
    %219 = arith.divf %217, %218 : vector<2x128xf32>
    %220 = arith.mulf %10, %219 : vector<2x128xf32>
    %221 = arith.addf %220, %15 : vector<2x128xf32>
    %c64_i32_79 = arith.constant 64 : i32
    %222 = tpu.dynamic_rotate %221 by %c64_i32_79 dim 1 : vector<2x128xf32>, i32 -> vector<2x128xf32>
    %223 = arith.mulf %222, %188 : vector<2x128xf32>
    %c96_i32_80 = arith.constant 96 : i32
    %224 = tpu.dynamic_rotate %221 by %c96_i32_80 dim 1 : vector<2x128xf32>, i32 -> vector<2x128xf32>
    %c32_i32_81 = arith.constant 32 : i32
    %225 = tpu.dynamic_rotate %221 by %c32_i32_81 dim 1 : vector<2x128xf32>, i32 -> vector<2x128xf32>
    %226 = arith.mulf %224, %225 : vector<2x128xf32>
    %227 = arith.addf %223, %226 : vector<2x128xf32>
    %228 = math.tanh %227 : vector<2x128xf32>
    %229 = arith.mulf %221, %228 : vector<2x128xf32>
    %230 = arith.truncf %229 : vector<2x128xf32> to vector<2x128xbf16>
    %231 = vector.extract_strided_slice %27 {offsets = [10, 0], sizes = [2, 128], strides = [1, 1]} : vector<16x128xf32> to vector<2x128xf32>
    %cst_82 = arith.constant dense<0.000000e+00> : vector<2x128xf32>
    %232 = tpu.matmul %210, %18, %cst_82 {dimension_numbers = #tpu.dot_dimension_numbers<[1], [0], [0], [1], [0, 0, 1, 1], [], []>} : vector<2x128xbf16>, vector<128x128xbf16>, vector<2x128xf32> -> vector<2x128xf32>
    %233 = arith.addf %231, %232 : vector<2x128xf32>
    %234 = arith.negf %233 : vector<2x128xf32>
    %235 = math.exp %234 : vector<2x128xf32>
    %cst_83 = arith.constant 1.000000e+00 : f32
    %236 = vector.broadcast %cst_83 : f32 to vector<2x128xf32>
    %237 = arith.addf %236, %235 : vector<2x128xf32>
    %238 = arith.divf %236, %237 : vector<2x128xf32>
    %239 = arith.mulf %10, %238 : vector<2x128xf32>
    %240 = arith.addf %239, %15 : vector<2x128xf32>
    %c64_i32_84 = arith.constant 64 : i32
    %241 = tpu.dynamic_rotate %240 by %c64_i32_84 dim 1 : vector<2x128xf32>, i32 -> vector<2x128xf32>
    %242 = arith.mulf %241, %207 : vector<2x128xf32>
    %c96_i32_85 = arith.constant 96 : i32
    %243 = tpu.dynamic_rotate %240 by %c96_i32_85 dim 1 : vector<2x128xf32>, i32 -> vector<2x128xf32>
    %c32_i32_86 = arith.constant 32 : i32
    %244 = tpu.dynamic_rotate %240 by %c32_i32_86 dim 1 : vector<2x128xf32>, i32 -> vector<2x128xf32>
    %245 = arith.mulf %243, %244 : vector<2x128xf32>
    %246 = arith.addf %242, %245 : vector<2x128xf32>
    %247 = math.tanh %246 : vector<2x128xf32>
    %248 = arith.mulf %240, %247 : vector<2x128xf32>
    %249 = arith.truncf %248 : vector<2x128xf32> to vector<2x128xbf16>
    %cst_87 = arith.constant dense<0.000000e+00> : vector<2x128xf32>
    %250 = tpu.matmul %249, %17, %cst_87 {dimension_numbers = #tpu.dot_dimension_numbers<[1], [0], [0], [1], [0, 0, 1, 1], [], []>} : vector<2x128xbf16>, vector<128x128xbf16>, vector<2x128xf32> -> vector<2x128xf32>
    %251 = arith.addf %250, %23 : vector<2x128xf32>
    %cst_88 = arith.constant dense<0.000000e+00> : vector<2x128xf32>
    %252 = tpu.matmul %230, %19, %cst_88 {dimension_numbers = #tpu.dot_dimension_numbers<[1], [0], [0], [1], [0, 0, 1, 1], [], []>} : vector<2x128xbf16>, vector<128x128xbf16>, vector<2x128xf32> -> vector<2x128xf32>
    %253 = arith.addf %251, %252 : vector<2x128xf32>
    %254 = arith.negf %253 : vector<2x128xf32>
    %255 = math.exp %254 : vector<2x128xf32>
    %cst_89 = arith.constant 1.000000e+00 : f32
    %256 = vector.broadcast %cst_89 : f32 to vector<2x128xf32>
    %257 = arith.addf %256, %255 : vector<2x128xf32>
    %258 = arith.divf %256, %257 : vector<2x128xf32>
    %259 = arith.mulf %10, %258 : vector<2x128xf32>
    %260 = arith.addf %259, %15 : vector<2x128xf32>
    %c64_i32_90 = arith.constant 64 : i32
    %261 = tpu.dynamic_rotate %260 by %c64_i32_90 dim 1 : vector<2x128xf32>, i32 -> vector<2x128xf32>
    %262 = arith.mulf %261, %227 : vector<2x128xf32>
    %c96_i32_91 = arith.constant 96 : i32
    %263 = tpu.dynamic_rotate %260 by %c96_i32_91 dim 1 : vector<2x128xf32>, i32 -> vector<2x128xf32>
    %c32_i32_92 = arith.constant 32 : i32
    %264 = tpu.dynamic_rotate %260 by %c32_i32_92 dim 1 : vector<2x128xf32>, i32 -> vector<2x128xf32>
    %265 = arith.mulf %263, %264 : vector<2x128xf32>
    %266 = arith.addf %262, %265 : vector<2x128xf32>
    %267 = math.tanh %266 : vector<2x128xf32>
    %268 = arith.mulf %260, %267 : vector<2x128xf32>
    %269 = arith.truncf %268 : vector<2x128xf32> to vector<2x128xbf16>
    %270 = vector.extract_strided_slice %27 {offsets = [12, 0], sizes = [2, 128], strides = [1, 1]} : vector<16x128xf32> to vector<2x128xf32>
    %cst_93 = arith.constant dense<0.000000e+00> : vector<2x128xf32>
    %271 = tpu.matmul %249, %18, %cst_93 {dimension_numbers = #tpu.dot_dimension_numbers<[1], [0], [0], [1], [0, 0, 1, 1], [], []>} : vector<2x128xbf16>, vector<128x128xbf16>, vector<2x128xf32> -> vector<2x128xf32>
    %272 = arith.addf %270, %271 : vector<2x128xf32>
    %273 = arith.negf %272 : vector<2x128xf32>
    %274 = math.exp %273 : vector<2x128xf32>
    %cst_94 = arith.constant 1.000000e+00 : f32
    %275 = vector.broadcast %cst_94 : f32 to vector<2x128xf32>
    %276 = arith.addf %275, %274 : vector<2x128xf32>
    %277 = arith.divf %275, %276 : vector<2x128xf32>
    %278 = arith.mulf %10, %277 : vector<2x128xf32>
    %279 = arith.addf %278, %15 : vector<2x128xf32>
    %c64_i32_95 = arith.constant 64 : i32
    %280 = tpu.dynamic_rotate %279 by %c64_i32_95 dim 1 : vector<2x128xf32>, i32 -> vector<2x128xf32>
    %281 = arith.mulf %280, %246 : vector<2x128xf32>
    %c96_i32_96 = arith.constant 96 : i32
    %282 = tpu.dynamic_rotate %279 by %c96_i32_96 dim 1 : vector<2x128xf32>, i32 -> vector<2x128xf32>
    %c32_i32_97 = arith.constant 32 : i32
    %283 = tpu.dynamic_rotate %279 by %c32_i32_97 dim 1 : vector<2x128xf32>, i32 -> vector<2x128xf32>
    %284 = arith.mulf %282, %283 : vector<2x128xf32>
    %285 = arith.addf %281, %284 : vector<2x128xf32>
    %286 = math.tanh %285 : vector<2x128xf32>
    %287 = arith.mulf %279, %286 : vector<2x128xf32>
    %288 = arith.truncf %287 : vector<2x128xf32> to vector<2x128xbf16>
    %cst_98 = arith.constant dense<0.000000e+00> : vector<2x128xf32>
    %289 = tpu.matmul %288, %17, %cst_98 {dimension_numbers = #tpu.dot_dimension_numbers<[1], [0], [0], [1], [0, 0, 1, 1], [], []>} : vector<2x128xbf16>, vector<128x128xbf16>, vector<2x128xf32> -> vector<2x128xf32>
    %290 = arith.addf %289, %23 : vector<2x128xf32>
    %cst_99 = arith.constant dense<0.000000e+00> : vector<2x128xf32>
    %291 = tpu.matmul %269, %19, %cst_99 {dimension_numbers = #tpu.dot_dimension_numbers<[1], [0], [0], [1], [0, 0, 1, 1], [], []>} : vector<2x128xbf16>, vector<128x128xbf16>, vector<2x128xf32> -> vector<2x128xf32>
    %292 = arith.addf %290, %291 : vector<2x128xf32>
    %293 = arith.negf %292 : vector<2x128xf32>
    %294 = math.exp %293 : vector<2x128xf32>
    %cst_100 = arith.constant 1.000000e+00 : f32
    %295 = vector.broadcast %cst_100 : f32 to vector<2x128xf32>
    %296 = arith.addf %295, %294 : vector<2x128xf32>
    %297 = arith.divf %295, %296 : vector<2x128xf32>
    %298 = arith.mulf %10, %297 : vector<2x128xf32>
    %299 = arith.addf %298, %15 : vector<2x128xf32>
    %c64_i32_101 = arith.constant 64 : i32
    %300 = tpu.dynamic_rotate %299 by %c64_i32_101 dim 1 : vector<2x128xf32>, i32 -> vector<2x128xf32>
    %301 = arith.mulf %300, %266 : vector<2x128xf32>
    %c96_i32_102 = arith.constant 96 : i32
    %302 = tpu.dynamic_rotate %299 by %c96_i32_102 dim 1 : vector<2x128xf32>, i32 -> vector<2x128xf32>
    %c32_i32_103 = arith.constant 32 : i32
    %303 = tpu.dynamic_rotate %299 by %c32_i32_103 dim 1 : vector<2x128xf32>, i32 -> vector<2x128xf32>
    %304 = arith.mulf %302, %303 : vector<2x128xf32>
    %305 = arith.addf %301, %304 : vector<2x128xf32>
    %306 = math.tanh %305 : vector<2x128xf32>
    %307 = arith.mulf %299, %306 : vector<2x128xf32>
    %308 = arith.truncf %307 : vector<2x128xf32> to vector<2x128xbf16>
    %309 = vector.extract_strided_slice %27 {offsets = [14, 0], sizes = [2, 128], strides = [1, 1]} : vector<16x128xf32> to vector<2x128xf32>
    %cst_104 = arith.constant dense<0.000000e+00> : vector<2x128xf32>
    %310 = tpu.matmul %288, %18, %cst_104 {dimension_numbers = #tpu.dot_dimension_numbers<[1], [0], [0], [1], [0, 0, 1, 1], [], []>} : vector<2x128xbf16>, vector<128x128xbf16>, vector<2x128xf32> -> vector<2x128xf32>
    %311 = arith.addf %309, %310 : vector<2x128xf32>
    %312 = arith.negf %311 : vector<2x128xf32>
    %313 = math.exp %312 : vector<2x128xf32>
    %cst_105 = arith.constant 1.000000e+00 : f32
    %314 = vector.broadcast %cst_105 : f32 to vector<2x128xf32>
    %315 = arith.addf %314, %313 : vector<2x128xf32>
    %316 = arith.divf %314, %315 : vector<2x128xf32>
    %317 = arith.mulf %10, %316 : vector<2x128xf32>
    %318 = arith.addf %317, %15 : vector<2x128xf32>
    %c64_i32_106 = arith.constant 64 : i32
    %319 = tpu.dynamic_rotate %318 by %c64_i32_106 dim 1 : vector<2x128xf32>, i32 -> vector<2x128xf32>
    %320 = arith.mulf %319, %285 : vector<2x128xf32>
    %c96_i32_107 = arith.constant 96 : i32
    %321 = tpu.dynamic_rotate %318 by %c96_i32_107 dim 1 : vector<2x128xf32>, i32 -> vector<2x128xf32>
    %c32_i32_108 = arith.constant 32 : i32
    %322 = tpu.dynamic_rotate %318 by %c32_i32_108 dim 1 : vector<2x128xf32>, i32 -> vector<2x128xf32>
    %323 = arith.mulf %321, %322 : vector<2x128xf32>
    %324 = arith.addf %320, %323 : vector<2x128xf32>
    %325 = math.tanh %324 : vector<2x128xf32>
    %326 = arith.mulf %318, %325 : vector<2x128xf32>
    %327 = arith.truncf %326 : vector<2x128xf32> to vector<2x128xbf16>
    %cst_109 = arith.constant dense<0.000000e+00> : vector<2x128xf32>
    %328 = tpu.matmul %327, %17, %cst_109 {dimension_numbers = #tpu.dot_dimension_numbers<[1], [0], [0], [1], [0, 0, 1, 1], [], []>} : vector<2x128xbf16>, vector<128x128xbf16>, vector<2x128xf32> -> vector<2x128xf32>
    %329 = arith.addf %328, %23 : vector<2x128xf32>
    %cst_110 = arith.constant dense<0.000000e+00> : vector<2x128xf32>
    %330 = tpu.matmul %308, %19, %cst_110 {dimension_numbers = #tpu.dot_dimension_numbers<[1], [0], [0], [1], [0, 0, 1, 1], [], []>} : vector<2x128xbf16>, vector<128x128xbf16>, vector<2x128xf32> -> vector<2x128xf32>
    %331 = arith.addf %329, %330 : vector<2x128xf32>
    %332 = arith.negf %331 : vector<2x128xf32>
    %333 = math.exp %332 : vector<2x128xf32>
    %cst_111 = arith.constant 1.000000e+00 : f32
    %334 = vector.broadcast %cst_111 : f32 to vector<2x128xf32>
    %335 = arith.addf %334, %333 : vector<2x128xf32>
    %336 = arith.divf %334, %335 : vector<2x128xf32>
    %337 = arith.mulf %10, %336 : vector<2x128xf32>
    %338 = arith.addf %337, %15 : vector<2x128xf32>
    %c64_i32_112 = arith.constant 64 : i32
    %339 = tpu.dynamic_rotate %338 by %c64_i32_112 dim 1 : vector<2x128xf32>, i32 -> vector<2x128xf32>
    %340 = arith.mulf %339, %305 : vector<2x128xf32>
    %c96_i32_113 = arith.constant 96 : i32
    %341 = tpu.dynamic_rotate %338 by %c96_i32_113 dim 1 : vector<2x128xf32>, i32 -> vector<2x128xf32>
    %c32_i32_114 = arith.constant 32 : i32
    %342 = tpu.dynamic_rotate %338 by %c32_i32_114 dim 1 : vector<2x128xf32>, i32 -> vector<2x128xf32>
    %343 = arith.mulf %341, %342 : vector<2x128xf32>
    %344 = arith.addf %340, %343 : vector<2x128xf32>
    %345 = math.tanh %344 : vector<2x128xf32>
    %346 = arith.mulf %338, %345 : vector<2x128xf32>
    %347 = arith.truncf %346 : vector<2x128xf32> to vector<2x128xbf16>
    %c0_115 = arith.constant 0 : index
    %c0_116 = arith.constant 0 : index
    %348 = vector.load %arg7[%c0_115, %c0_116] : memref<128x4xbf16, #tpu.memory_space<vmem>>, vector<128x4xbf16>
    %cst_117 = arith.constant dense<0.000000e+00> : vector<2x4xf32>
    %349 = tpu.matmul %347, %348, %cst_117 {dimension_numbers = #tpu.dot_dimension_numbers<[1], [0], [0], [1], [0, 0, 1, 1], [], []>} : vector<2x128xbf16>, vector<128x4xbf16>, vector<2x4xf32> -> vector<2x4xf32>
    %c0_118 = arith.constant 0 : index
    %c0_119 = arith.constant 0 : index
    %350 = vector.load %arg8[%c0_118, %c0_119] : memref<1x4xf32, #tpu.memory_space<vmem>>, vector<1x4xf32>
    %351 = vector.broadcast %350 : vector<1x4xf32> to vector<2x4xf32>
    %352 = arith.addf %349, %351 : vector<2x4xf32>
    %c0_120 = arith.constant 0 : index
    %c0_121 = arith.constant 0 : index
    %353 = vector.load %arg11[%c0_120, %c0_121] : memref<2x4xf32, #tpu.memory_space<vmem>>, vector<2x4xf32>
    tpu.vector_store %arg11[%c0_120, %c0_121], %352 {strides = array<i32>} : memref<2x4xf32, #tpu.memory_space<vmem>>, vector<2x4xf32>,
    return
  }
}

</mosaic_0001>

<bundles_post_ra>
// kernel: tile.19
= control target key start
LH: loop header
LB: loop body
LE: loop exit
PB: predicated region body
PF: predicated region fallthrough
CT: control target
= control target key end

     0   :  { %vm22_vm0 = vcmask 261120   ;;  %s74_s14 = smov 32   ;;  %s75_s15 = smov 64   ;;  %vm30_vm1 = vcmask 1048320   ;;  %vm38_vm2 = vcmask 785920   ;;  %vm46_vm3 = vcmask 523520   ;;  %s104_s0 = inlined_call_operand.vmem [shape: f32[2,2,4,32], index: 0, kind: input, shape index: {}]   ;;  %s105_s1 = inlined_call_operand.vmem [shape: f32[2,2,128], index: 1, kind: output, shape index: {}]  }
   0x1   :  { %v66_v0 = vld [vmem:[%s104_s0 + $0xc] sm:$0xf]  ;;  %v67_v1 = vld [vmem:[%s104_s0 + $0x8] sm:$0xf]  ;;  %v68_v2 = vld [vmem:[%s104_s0 + $0x4] sm:$0xf] }
   0x2   :  { %9 = vst [vmem:[#allocation1 + $0x18] sm:$0xf] %v66_v0  ;;  %14 = vst [vmem:[#allocation1 + $0x10] sm:$0xf] %v67_v1  ;;  %v19_v3 = vld [vmem:[%s104_s0] sm:$0xf] }
   0x3   :  { %18 = vst [vmem:[#allocation1 + $0x8] sm:$0xf] %v68_v2  ;;  %20 = vst [vmem:[#allocation1] sm:$0xf] %v19_v3  ;;  %s73_s0 = smov 96  }
   0xa   :  { %v27_v4 = vld [vmem:[#allocation1 + $0x3] ss:$8 sm:$0xf]   ;;  %v43_v5 = vld [vmem:[#allocation1 + $0x1] ss:$8 sm:$0xf]  }
   0xb   :  { %28 = vrot.lane.b32.xlu0 %v27_v4, %s73_s0  ;;  %v21_v6 = vld [vmem:[#allocation1] ss:$8 sm:$0xf]   ;;  %v35_v7 = vld [vmem:[#allocation1 + $0x2] ss:$8 sm:$0xf]   ;;  %44 = vrot.lane.b32.xlu1 %v43_v5, %s74_s14 }
   0xc   :  { %23 = vst.msk [vmem:[#allocation0] sm:$0x3] %vm22_vm0, %v21_v6   ;;  %25 = vst.msk [vmem:[#allocation0 + $0x6] sm:$0xc] %vm22_vm0, %v21_v6  }
   0xf   :  { %36 = vrot.lane.b32.xlu0 %v35_v7, %s75_s15 }
  0x7d   :  { %v29_v8 = vpop.permute.xlu0 %28   ;;  %v45_v9 = vpop.permute.xlu1 %44  }
  0x7e   :  { %31 = vst.msk [vmem:[#allocation0] sm:$0x3] %vm30_vm1, %v29_v8   ;;  %33 = vst.msk [vmem:[#allocation0 + $0x6] sm:$0xc] %vm30_vm1, %v29_v8  }
  0x81   :  { %v37_v10 = vpop.permute.xlu0 %36  }
  0x82   :  { %39 = vst.msk [vmem:[#allocation0] sm:$0x3] %vm38_vm2, %v37_v10   ;;  %41 = vst.msk [vmem:[#allocation0 + $0x6] sm:$0xc] %vm38_vm2, %v37_v10  }
  0x83   :  { %47 = vst.msk [vmem:[#allocation0] sm:$0x3] %vm46_vm3, %v45_v9   ;;  %49 = vst.msk [vmem:[#allocation0 + $0x6] sm:$0xc] %vm46_vm3, %v45_v9  }
  0x8a   :  { %v54_v11 = vld [vmem:[#allocation0] sm:$0x3]  ;;  %v59_v12 = vld [vmem:[#allocation0 + $0x8] sm:$0x3] }
  0x8b   :  { %57 = vst [vmem:[%s105_s1] sm:$0x3] %v54_v11  ;;  %69 = vst [vmem:[%s105_s1 + $0x2] sm:$0x3] %v59_v12 }

// kernel: net_forward.1
= control target key start
LH: loop header
LB: loop body
LE: loop exit
PB: predicated region body
PF: predicated region fallthrough
CT: control target
= control target key end

     0   :  { %16 = vsyncpa [#allocation3], 0  ;;  %s3755_s0 = inlined_call_operand.vmem [shape: bf16[16,16], index: 0, kind: input, shape index: {}]   ;;  %s3756_s1 = inlined_call_operand.vmem [shape: bf16[16,128], index: 1, kind: input, shape index: {}]   ;;  %s3757_s2 = inlined_call_operand.vmem [shape: bf16[128,128], index: 2, kind: input, shape index: {}]   ;;  %s3758_s3 = inlined_call_operand.vmem [shape: f32[1,128], index: 3, kind: input, shape index: {}]   ;;  %s3759_s4 = inlined_call_operand.vmem [shape: bf16[128,128], index: 4, kind: input, shape index: {}]   ;;  %s3760_s5 = inlined_call_operand.hbm [shape: bf16[128,128], index: 5, kind: input, shape index: {}]   ;;  %s3761_s6 = inlined_call_operand.vmem [shape: f32[1,128], index: 6, kind: input, shape index: {}]   ;;  %s3762_s7 = inlined_call_operand.vmem [shape: bf16[128,4], index: 7, kind: input, shape index: {}]   ;;  %s3763_s8 = inlined_call_operand.vmem [shape: f32[1,4], index: 8, kind: input, shape index: {}]   ;;  %s3764_s9 = inlined_call_operand.vmem [shape: bf16[2,2,128], index: 9, kind: input, shape index: {}]   ;;  %s3765_s10 = inlined_call_operand.vmem [shape: f32[2,2,128], index: 10, kind: input, shape index: {}]   ;;  %s3766_s11 = inlined_call_operand.hbm [shape: f32[2,4], index: 11, kind: output, shape index: {}]  }
   0x1   :  { %17 = vsyncpa [#allocation4], 0  ;;  %s2826_s17 = smov [#allocation2]  }
   0x2   :  { %s33_s18 = sshll.u32 %s2826_s17, 4  ;;  %s34_s18 = int_to_ptr.vmem [resolvable:$true] %s33_s18 }
   0x3   :  { %s2790_s19 = scalar_lea.vmem %s34_s18, 1024  ;;  %p2795_p1 = scmp.lt.s32.totalorder %s34_s18, %s34_s18 }
   0x4   :  { %p2791_p0 = scmp.ne.s32.totalorder %s34_s18, %s2790_s19  ;;  %p2796_p2 = scmp.lt.s32.totalorder %s2790_s19, %s2790_s19 }
   0x6   :  { %p2797_p3 = por %p2796_p2, %p2795_p1 }
   0x8   :  { %p2798_p4 = pnand %p2797_p3, %p2791_p0 }
   0xa   :  { %2801 = shalt.err (!%p2798_p4)
}
   0xb   :  { %s2827_s20 = smov 64   ;;  %s2828_s21 = smov 4  }
   0xc   :  { %39 = dma.hbm_to_vmem [thread:$0]  %s3760_s5, 1024, %s34_s18, [#allocation3], %s2827_s20, %s2827_s20, %s2828_s21  }
   0xd   :  { %2822 = dma.done.wait [#allocation3], 1024  }
   0xe   :  { %2823 = vsyncadd [#allocation3], 4294966272  ;;  %v2829_v0 = vmov 0.0   ;;  %vm2830_vm0 = vmmov 0   ;;  %v2909_v1 = vld [vmem:[%s3757_s2 + $0x38] sm:$0xff]   ;;  %v2915_v2 = vld [vmem:[%s3757_s2 + $0x30] sm:$0xff]   ;;  %v54_v29 = vlaneseq }
   0xf   :  { %2118 = vmatprep.subr.bf16.mxu1 %v2829_v0  ;;  %2112 = vmatprep.subr.bf16.mxu0 %v2829_v0  ;;  %v2632_v3 = vld [vmem:[%s3756_s1] sm:$0xff]   ;;  %v2925_v4 = vld [vmem:[%s3757_s2 + $0x28] sm:$0xff]   ;;  %vm138_vm1 = vcmask 130048   ;;  %v2944_v7 = vld [vmem:[%s3757_s2 + $0x18] sm:$0xff]   ;;  %v2831_v36 = vmov 1.0   ;;  %s2833_s19 = smov 96  }
  0x10   :  { %2114 = vmatprep.mubr.msk.bf16.mxu0 %vm2830_vm0, %v2829_v0  ;;  %2134 = vmatprep.mubr.msk.bf16.mxu1 %vm2830_vm0, %v2829_v0  ;;  %v2634_v5 = vld [vmem:[%s3755_s0] sm:$0xff]   ;;  %v2951_v8 = vld [vmem:[%s3757_s2 + $0x10] sm:$0xff]   ;;  %v2958_v9 = vld [vmem:[%s3757_s2 + $0x8] sm:$0xff]   ;;  %v55_v31 = vand.u32 127, %v54_v29  ;;  %s2832_s0 = smov 32   ;;  %vm1812_vm5 = vcmask 25600  }
  0x11   :  { %2119 = vmatpush3.bf16.msra.mxu1 %v2909_v1  ;;  %2113 = vmatpush3.bf16.msra.mxu0 %v2632_v3  ;;  %v2936_v6 = vld [vmem:[%s3757_s2 + $0x20] sm:$0xff]   ;;  %v2979_v12 = vld [vmem:[%s3759_s4 + $0x38] sm:$0xff]   ;;  %v2988_v14 = vld [vmem:[%s3759_s4 + $0x30] sm:$0xff]  }
  0x12   :  { %2120 = vmatprep.subr.bf16.mxu1 %v2829_v0  ;;  %2138 = vmatprep.subr.bf16.mxu0 %v2829_v0  ;;  %v2966_v10 = vld [vmem:[%s3757_s2] sm:$0xff]   ;;  %v2981_v13 = vld [vmem:[#allocation2 + $0x38] sm:$0xff]   ;;  %v3002_v32 = vld [vmem:[#allocation2 + $0x30] sm:$0xff]   ;;  %vm56_vm2 = vcmp.ge.s32.totalorder %v55_v31, 64  ;;  %vm57_vm3 = vcmp.lt.s32.totalorder %v55_v31, 96 }
  0x13   :  { %v183_v11 = vld [vmem:[%s3764_s9] sm:$0x1]  ;;  %v3007_v33 = vld [vmem:[%s3759_s4 + $0x28] sm:$0xff]   ;;  %vm58_vm4 = vmand %vm56_vm2, %vm57_vm3 }
  0x14   :  { %2115 = vmatmul.mubr.msk.bf16.vlgmr.msra.gmra.mxu0 %vm138_vm1, %v2634_v5  ;;  %v1830_v16 = vld [vmem:[%s3758_s3] ss:$0 sm:$0xff]  ;;  %v3013_v34 = vld [vmem:[#allocation2 + $0x28] sm:$0xff]   ;;  %v3021_v37 = vsel %vm58_vm4, 2.0, %v2831_v36  ;;  %v3029_v40 = vsel %vm58_vm4, -1.0, %v2829_v0  ;;  %v3034_v41 = vld [vmem:[%s3759_s4 + $0x18] sm:$0xff]  }
  0x15   :  { %2121 = vmatpush3.bf16.msra.mxu1 %v2915_v2  ;;  %2154 = vmatprep.mubr.msk.bf16.mxu0 %vm2830_vm0, %v2829_v0  ;;  %v3018_v35 = vld [vmem:[%s3759_s4 + $0x20] sm:$0xff]   ;;  %v3040_v43 = vld [vmem:[#allocation2 + $0x18] sm:$0xff]   ;;  %v3045_v44 = vld [vmem:[%s3759_s4 + $0x10] sm:$0xff]  }
  0x16   :  { %2122 = vmatprep.subr.bf16.mxu1 %v2829_v0  ;;  %2139 = vmatpush3.bf16.msra.mxu0 %v2979_v12  ;;  %v3026_v38 = vld [vmem:[#allocation2 + $0x20] sm:$0xff]   ;;  %v3053_v46 = vld [vmem:[#allocation2 + $0x10] sm:$0xff]   ;;  %v3058_v47 = vld [vmem:[%s3759_s4 + $0x8] sm:$0xff]  }
  0x17   :  { %2140 = vmatprep.subr.bf16.mxu0 %v2829_v0  ;;  %v3065_v48 = vld [vmem:[#allocation2 + $0x8] sm:$0xff]   ;;  %v3070_v49 = vld [vmem:[%s3759_s4] sm:$0xff]  }
  0x18   :  { %v3076_v50 = vld [vmem:[#allocation2] sm:$0xff]  }
  0x19   :  { %2123 = vmatpush3.bf16.msra.mxu1 %v2925_v4  ;;  %v1834_v51 = vld [vmem:[%s3764_s9 + $0x1] sm:$0x1] }
  0x1a   :  { %2124 = vmatprep.subr.bf16.mxu1 %v2829_v0  ;;  %2141 = vmatpush3.bf16.msra.mxu0 %v2988_v14  ;;  %v186_v53 = vld [vmem:[%s3765_s10] sm:$0x3] }
  0x1b   :  { %2142 = vmatprep.subr.bf16.mxu0 %v2829_v0 }
  0x1d   :  { %2125 = vmatpush3.bf16.msra.mxu1 %v2936_v6 }
  0x1e   :  { %2126 = vmatprep.subr.bf16.mxu1 %v2829_v0  ;;  %2143 = vmatpush3.bf16.msra.mxu0 %v3007_v33 }
  0x1f   :  { %2144 = vmatprep.subr.bf16.mxu0 %v2829_v0 }
  0x21   :  { %2127 = vmatpush3.bf16.msra.mxu1 %v2944_v7 }
  0x22   :  { %2128 = vmatprep.subr.bf16.mxu1 %v2829_v0  ;;  %2145 = vmatpush3.bf16.msra.mxu0 %v3018_v35 }
  0x23   :  { %2146 = vmatprep.subr.bf16.mxu0 %v2829_v0 }
  0x25   :  { %2129 = vmatpush3.bf16.msra.mxu1 %v2951_v8 }
  0x26   :  { %2130 = vmatprep.subr.bf16.mxu1 %v2829_v0  ;;  %2147 = vmatpush3.bf16.msra.mxu0 %v3034_v41 }
  0x27   :  { %2148 = vmatprep.subr.bf16.mxu0 %v2829_v0 }
  0x29   :  { %2131 = vmatpush3.bf16.msra.mxu1 %v2958_v9 }
  0x2a   :  { %2132 = vmatprep.subr.bf16.mxu1 %v2829_v0  ;;  %2149 = vmatpush3.bf16.msra.mxu0 %v3045_v44 }
  0x2b   :  { %2150 = vmatprep.subr.bf16.mxu0 %v2829_v0 }
  0x2d   :  { %2133 = vmatpush3.bf16.msra.mxu1 %v2966_v10 }
  0x2e   :  { %2158 = vmatprep.subr.bf16.mxu1 %v2829_v0  ;;  %2151 = vmatpush3.bf16.msra.mxu0 %v3058_v47 }
  0x2f   :  { %2152 = vmatprep.subr.bf16.mxu0 %v2829_v0 }
  0x30   :  { %2135 = vmatmul.mubr.bf16.vlgmr.msra.gmra.mxu1 %v183_v11 }
  0x31   :  { %2174 = vmatprep.mubr.msk.bf16.mxu1 %vm2830_vm0, %v2829_v0  ;;  %2159 = vmatpush3.bf16.msra.mxu1 %v2981_v13 }
  0x32   :  { %2160 = vmatprep.subr.bf16.mxu1 %v2829_v0  ;;  %2153 = vmatpush3.bf16.msra.mxu0 %v3070_v49 }
  0x33   :  { %2178 = vmatprep.subr.bf16.mxu0 %v2829_v0 }
  0x35   :  { %2161 = vmatpush3.bf16.msra.mxu1 %v3002_v32 }
  0x36   :  { %2162 = vmatprep.subr.bf16.mxu1 %v2829_v0 }
  0x39   :  { %2163 = vmatpush3.bf16.msra.mxu1 %v3013_v34 }
  0x3a   :  { %2164 = vmatprep.subr.bf16.mxu1 %v2829_v0 }
  0x3d   :  { %2165 = vmatpush3.bf16.msra.mxu1 %v3026_v38 }
  0x3e   :  { %2166 = vmatprep.subr.bf16.mxu1 %v2829_v0 }
  0x41   :  { %2167 = vmatpush3.bf16.msra.mxu1 %v3040_v43 }
  0x42   :  { %2168 = vmatprep.subr.bf16.mxu1 %v2829_v0 }
  0x45   :  { %2169 = vmatpush3.bf16.msra.mxu1 %v3053_v46 }
  0x46   :  { %2170 = vmatprep.subr.bf16.mxu1 %v2829_v0 }
  0x49   :  { %2171 = vmatpush3.bf16.msra.mxu1 %v3065_v48 }
  0x4a   :  { %2172 = vmatprep.subr.bf16.mxu1 %v2829_v0 }
  0x4d   :  { %2173 = vmatpush3.bf16.msra.mxu1 %v3076_v50 }
  0x4e   :  { %2198 = vmatprep.subr.bf16.mxu1 %v2829_v0 }
  0x50   :  { %2175 = vmatmul.mubr.bf16.vlgmr.msra.gmra.mxu1 %v1834_v51 }
  0x51   :  { %2199 = vmatpush3.bf16.msra.mxu1 %v2979_v12  ;;  %2214 = vmatprep.mubr.msk.bf16.mxu1 %vm2830_vm0, %v2829_v0 }
  0x52   :  { %2200 = vmatprep.subr.bf16.mxu1 %v2829_v0 }
  0x55   :  { %2201 = vmatpush3.bf16.msra.mxu1 %v2988_v14 }
  0x56   :  { %2202 = vmatprep.subr.bf16.mxu1 %v2829_v0 }
  0x59   :  { %2203 = vmatpush3.bf16.msra.mxu1 %v3007_v33 }
  0x5a   :  { %2204 = vmatprep.subr.bf16.mxu1 %v2829_v0 }
  0x5d   :  { %2205 = vmatpush3.bf16.msra.mxu1 %v3018_v35 }
  0x5e   :  { %2206 = vmatprep.subr.bf16.mxu1 %v2829_v0 }
  0x61   :  { %2207 = vmatpush3.bf16.msra.mxu1 %v3034_v41 }
  0x62   :  { %2208 = vmatprep.subr.bf16.mxu1 %v2829_v0 }
  0x65   :  { %2209 = vmatpush3.bf16.msra.mxu1 %v3045_v44 }
  0x66   :  { %2210 = vmatprep.subr.bf16.mxu1 %v2829_v0 }
  0x69   :  { %2211 = vmatpush3.bf16.msra.mxu1 %v3058_v47 }
  0x6a   :  { %2212 = vmatprep.subr.bf16.mxu1 %v2829_v0 }
  0x6d   :  { %2213 = vmatpush3.bf16.msra.mxu1 %v3070_v49 }
  0x6e   :  { %2238 = vmatprep.subr.bf16.mxu1 %v2829_v0 }
  0xd4   :  { %v176_v15 = vpop.f32.mrf.mxu0 }
  0xd5   :  { %v2999_v21 = vadd.f32 %v1830_v16, %v176_v15 }
  0xd6   :  { %v2116_v17 = vpop.f32.mrf.mxu0 }
  0xd8   :  { %v179_v18 = vpop.f32.mrf.mxu0 }
  0xd9   :  { %v2997_v19 = vadd.f32 %v1830_v16, %v179_v18  ;;  %v3148_v18 = vld [vmem:[%s3761_s6] ss:$0 sm:$0xff] }
  0xda   :  { %v2117_v20 = vpop.f32.mrf.mxu0 }
  0xf0   :  { %v271_v22 = vpop.f32.mrf.mxu1 }
  0xf1   :  { %v277_v23 = vadd.f32 %v271_v22, %v2999_v21 }
  0xf2   :  { %v2136_v24 = vpop.f32.mrf.mxu1 }
  0xf3   :  { %v1844_v25 = vmul.f32 -1.442695, %v277_v23 }
  0xf4   :  { %v274_v26 = vpop.f32.mrf.mxu1 }
  0xf5   :  { %2661 = vpow2.f32 %v1844_v25 }
  0xf6   :  { %v2137_v27 = vpop.f32.mrf.mxu1 }
 0x102   :  { %v2662_v28 = vpop.eup %2661 }
 0x103   :  { %v281_v30 = vadd.f32 1.0, %v2662_v28 }
 0x105   :  { %2663 = vrcp.f32 %v281_v30 }
 0x110   :  { %v468_v62 = vpop.f32.mrf.mxu1 }
 0x112   :  { %v2664_v39 = vpop.eup %2663  ;;  %v2176_v63 = vpop.f32.mrf.mxu1 }
 0x113   :  { %v284_v42 = vmul.f32 %v2664_v39, %v3021_v37 }
 0x114   :  { %v471_v3 = vpop.f32.mrf.mxu1 }
 0x115   :  { %v285_v45 = vadd.f32 %v284_v42, %v3029_v40  ;;  %v1835_v3 = vld [vmem:[%s3765_s10 + $0x2] sm:$0x3] }
 0x116   :  { %v2177_v5 = vpop.f32.mrf.mxu1 }
 0x117   :  { %291 = vrot.lane.b32.xlu1 %v285_v45, %s2832_s0  ;;  %286 = vrot.lane.b32.xlu0 %v285_v45, %s2827_s20 }
 0x11b   :  { %289 = vrot.lane.b32.xlu0 %v285_v45, %s2833_s19 }
 0x189   :  { %v287_v52 = vpop.permute.xlu0 %286  ;;  %v292_v54 = vpop.permute.xlu1 %291 }
 0x18a   :  { %v288_v56 = vmul.f32 %v287_v52, %v186_v53 }
 0x18d   :  { %v290_v55 = vpop.permute.xlu0 %289 }
 0x18e   :  { %v293_v57 = vmul.f32 %v292_v54, %v290_v55 }
 0x190   :  { %v3106_v58 = vadd.f32 %v293_v57, %v288_v56 }
 0x192   :  { %2665 = vtanh.f32 %v3106_v58 }
 0x19f   :  { %v2666_v59 = vpop.eup %2665 }
 0x1a0   :  { %v296_v60 = vmul.f32 %v2666_v59, %v285_v45 }
 0x1a2   :  { %v297_v61 = vpack.c.bf16 %v296_v60, %v296_v60 }
 0x1a4   :  { %2155 = vmatmul.mubr.bf16.vlgmr.msra.gmra.mxu0 %v297_v61 }
 0x1a5   :  { %2179 = vmatpush3.bf16.msra.mxu0 %v2909_v1  ;;  %2194 = vmatprep.mubr.msk.bf16.mxu0 %vm2830_vm0, %v2829_v0 }
 0x1a6   :  { %2180 = vmatprep.subr.bf16.mxu0 %v2829_v0 }
 0x1a9   :  { %2181 = vmatpush3.bf16.msra.mxu0 %v2915_v2 }
 0x1aa   :  { %2182 = vmatprep.subr.bf16.mxu0 %v2829_v0 }
 0x1ad   :  { %2183 = vmatpush3.bf16.msra.mxu0 %v2925_v4 }
 0x1ae   :  { %2184 = vmatprep.subr.bf16.mxu0 %v2829_v0 }
 0x1b1   :  { %2185 = vmatpush3.bf16.msra.mxu0 %v2936_v6 }
 0x1b2   :  { %2186 = vmatprep.subr.bf16.mxu0 %v2829_v0 }
 0x1b5   :  { %2187 = vmatpush3.bf16.msra.mxu0 %v2944_v7 }
 0x1b6   :  { %2188 = vmatprep.subr.bf16.mxu0 %v2829_v0 }
 0x1b9   :  { %2189 = vmatpush3.bf16.msra.mxu0 %v2951_v8 }
 0x1ba   :  { %2190 = vmatprep.subr.bf16.mxu0 %v2829_v0 }
 0x1bd   :  { %2191 = vmatpush3.bf16.msra.mxu0 %v2958_v9 }
 0x1be   :  { %2192 = vmatprep.subr.bf16.mxu0 %v2829_v0 }
 0x1c1   :  { %2193 = vmatpush3.bf16.msra.mxu0 %v2966_v10 }
 0x1c2   :  { %2218 = vmatprep.subr.bf16.mxu0 %v2829_v0 }
 0x1c4   :  { %2195 = vmatmul.mubr.bf16.vlgmr.msra.gmra.mxu0 %v297_v61 }
 0x1c5   :  { %2219 = vmatpush3.bf16.msra.mxu0 %v2981_v13  ;;  %2234 = vmatprep.mubr.msk.bf16.mxu0 %vm2830_vm0, %v2829_v0 }
 0x1c6   :  { %2220 = vmatprep.subr.bf16.mxu0 %v2829_v0 }
 0x1c9   :  { %2221 = vmatpush3.bf16.msra.mxu0 %v3002_v32 }
 0x1ca   :  { %2222 = vmatprep.subr.bf16.mxu0 %v2829_v0 }
 0x1cd   :  { %2223 = vmatpush3.bf16.msra.mxu0 %v3013_v34 }
 0x1ce   :  { %2224 = vmatprep.subr.bf16.mxu0 %v2829_v0 }
 0x1d1   :  { %2225 = vmatpush3.bf16.msra.mxu0 %v3026_v38 }
 0x1d2   :  { %2226 = vmatprep.subr.bf16.mxu0 %v2829_v0 }
 0x1d5   :  { %2227 = vmatpush3.bf16.msra.mxu0 %v3040_v43 }
 0x1d6   :  { %2228 = vmatprep.subr.bf16.mxu0 %v2829_v0 }
 0x1d9   :  { %2229 = vmatpush3.bf16.msra.mxu0 %v3053_v46 }
 0x1da   :  { %2230 = vmatprep.subr.bf16.mxu0 %v2829_v0 }
 0x1dd   :  { %2231 = vmatpush3.bf16.msra.mxu0 %v3065_v48 }
 0x1de   :  { %2232 = vmatprep.subr.bf16.mxu0 %v2829_v0 }
 0x1e1   :  { %2233 = vmatpush3.bf16.msra.mxu0 %v3076_v50 }
 0x1e2   :  { %2258 = vmatprep.subr.bf16.mxu0 %v2829_v0 }
 0x264   :  { %v380_v11 = vpop.f32.mrf.mxu0 }
 0x265   :  { %v381_v20 = vadd.f32 %v3148_v18, %v380_v11 }
 0x266   :  { %v2156_v15 = vpop.f32.mrf.mxu0 }
 0x267   :  { %v474_v22 = vadd.f32 %v468_v62, %v381_v20 }
 0x268   :  { %v383_v16 = vpop.f32.mrf.mxu0 }
 0x269   :  { %v1861_v24 = vmul.f32 -1.442695, %v474_v22 }
 0x26a   :  { %v2157_v17 = vpop.f32.mrf.mxu0 }
 0x26b   :  { %2667 = vpow2.f32 %v1861_v24 }
 0x278   :  { %v2668_v31 = vpop.eup %2667 }
 0x279   :  { %v478_v39 = vadd.f32 1.0, %v2668_v31 }
 0x284   :  { %v529_v23 = vpop.f32.mrf.mxu0 }
 0x285   :  { %v536_v25 = vrot.slane %v529_v23, 6 }
 0x286   :  { %v2196_v26 = vpop.f32.mrf.mxu0 }
 0x287   :  { %v538_v27 = vadd.f32 %v536_v25, %v2999_v21 }
 0x288   :  { %v532_v28 = vpop.f32.mrf.mxu0 }
 0x289   :  { %v1862_v29 = vmul.f32 -1.442695, %v538_v27 }
 0x28a   :  { %v2197_v30 = vpop.f32.mrf.mxu0 }
 0x28b   :  { %2669 = vpow2.f32 %v1862_v29 }
 0x298   :  { %v2670_v36 = vpop.eup %2669 }
 0x299   :  { %v542_v42 = vadd.f32 1.0, %v2670_v36 }
 0x29b   :  { %2671 = vrcp.f32 %v542_v42 }
 0x29c   :  { %2673 = vrcp.f32 %v478_v39 }
 0x2a8   :  { %v2672_v45 = vpop.eup %2671 }
 0x2a9   :  { %v545_v51 = vmul.f32 %v2672_v45, %v3021_v37  ;;  %v2674_v52 = vpop.eup %2673 }
 0x2aa   :  { %v481_v55 = vmul.f32 %v2674_v52, %v3021_v37 }
 0x2ab   :  { %v546_v53 = vadd.f32 %v545_v51, %v3029_v40 }
 0x2ac   :  { %v482_v56 = vadd.f32 %v481_v55, %v3029_v40 }
 0x2ad   :  { %v548_v54 = vrot.slane %v546_v53, 2 }
 0x2af   :  { %553 = vrot.lane.b32.xlu0 %v548_v54, %s2833_s19  ;;  %550 = vrot.lane.b32.xlu1 %v548_v54, %s2827_s20 }
 0x2b3   :  { %483 = vrot.lane.b32.xlu0 %v482_v56, %s2827_s20  ;;  %555 = vrot.lane.b32.xlu1 %v548_v54, %s2832_s0 }
 0x2b7   :  { %488 = vrot.lane.b32.xlu0 %v482_v56, %s2832_s0  ;;  %486 = vrot.lane.b32.xlu1 %v482_v56, %s2833_s19 }
 0x321   :  { %v554_v57 = vpop.permute.xlu0 %553  ;;  %v551_v59 = vpop.permute.xlu1 %550 }
 0x322   :  { %v552_v62 = vmul.f32 %v551_v59, %v3106_v58 }
 0x325   :  { %v484_v60 = vpop.permute.xlu0 %483  ;;  %v556_v61 = vpop.permute.xlu1 %555 }
 0x326   :  { %v557_v63 = vmul.f32 %v556_v61, %v554_v57  ;;  %v485_v16 = vmul.f32 %v1835_v3, %v484_v60 }
 0x328   :  { %v3166_v5 = vadd.f32 %v557_v63, %v552_v62 }
 0x329   :  { %v489_v11 = vpop.permute.xlu0 %488  ;;  %v487_v15 = vpop.permute.xlu1 %486 }
 0x32a   :  { %2675 = vtanh.f32 %v3166_v5  ;;  %v490_v17 = vmul.f32 %v489_v11, %v487_v15 }
 0x32c   :  { %v3169_v20 = vadd.f32 %v490_v17, %v485_v16 }
 0x32e   :  { %2677 = vtanh.f32 %v3169_v20 }
 0x337   :  { %v2676_v22 = vpop.eup %2675 }
 0x338   :  { %v561_v23 = vrot.slane %v2676_v22, 6 }
 0x33a   :  { %v563_v58 = vmul.f32 %v561_v23, %v546_v53 }
 0x33b   :  { %v2678_v24 = vpop.eup %2677 }
 0x33c   :  { %v564_v25 = vpack.c.bf16 %v563_v58, %v563_v58  ;;  %v493_v26 = vmul.f32 %v2678_v24, %v482_v56 }
 0x33e   :  { %v566_v27 = vrot.slane %v564_v25, 1  ;;  %v494_v28 = vpack.c.bf16 %v493_v26, %v493_v26 }
 0x340   :  { %2215 = vmatmul.mubr.bf16.vlgmr.msra.gmra.mxu1 %v566_v27  ;;  %2235 = vmatmul.mubr.bf16.vlgmr.msra.gmra.mxu0 %v494_v28 }
 0x341   :  { %2239 = vmatpush3.bf16.msra.mxu1 %v2909_v1  ;;  %2254 = vmatprep.mubr.msk.bf16.mxu1 %vm2830_vm0, %v2829_v0 }
 0x342   :  { %2240 = vmatprep.subr.bf16.mxu1 %v2829_v0  ;;  %2259 = vmatpush3.bf16.msra.mxu0 %v2979_v12 }
 0x343   :  { %2260 = vmatprep.subr.bf16.mxu0 %v2829_v0  ;;  %2274 = vmatprep.mubr.msk.bf16.mxu0 %vm2830_vm0, %v2829_v0 }
 0x345   :  { %2241 = vmatpush3.bf16.msra.mxu1 %v2915_v2 }
 0x346   :  { %2242 = vmatprep.subr.bf16.mxu1 %v2829_v0  ;;  %2261 = vmatpush3.bf16.msra.mxu0 %v2988_v14 }
 0x347   :  { %2262 = vmatprep.subr.bf16.mxu0 %v2829_v0 }
 0x349   :  { %2243 = vmatpush3.bf16.msra.mxu1 %v2925_v4 }
 0x34a   :  { %2244 = vmatprep.subr.bf16.mxu1 %v2829_v0  ;;  %2263 = vmatpush3.bf16.msra.mxu0 %v3007_v33 }
 0x34b   :  { %2264 = vmatprep.subr.bf16.mxu0 %v2829_v0 }
 0x34d   :  { %2245 = vmatpush3.bf16.msra.mxu1 %v2936_v6 }
 0x34e   :  { %2246 = vmatprep.subr.bf16.mxu1 %v2829_v0  ;;  %2265 = vmatpush3.bf16.msra.mxu0 %v3018_v35 }
 0x34f   :  { %2266 = vmatprep.subr.bf16.mxu0 %v2829_v0 }
 0x351   :  { %2247 = vmatpush3.bf16.msra.mxu1 %v2944_v7 }
 0x352   :  { %2248 = vmatprep.subr.bf16.mxu1 %v2829_v0  ;;  %2267 = vmatpush3.bf16.msra.mxu0 %v3034_v41 }
 0x353   :  { %2268 = vmatprep.subr.bf16.mxu0 %v2829_v0 }
 0x355   :  { %2249 = vmatpush3.bf16.msra.mxu1 %v2951_v8 }
 0x356   :  { %2250 = vmatprep.subr.bf16.mxu1 %v2829_v0  ;;  %2269 = vmatpush3.bf16.msra.mxu0 %v3045_v44 }
 0x357   :  { %2270 = vmatprep.subr.bf16.mxu0 %v2829_v0 }
 0x359   :  { %2251 = vmatpush3.bf16.msra.mxu1 %v2958_v9 }
 0x35a   :  { %2252 = vmatprep.subr.bf16.mxu1 %v2829_v0  ;;  %2271 = vmatpush3.bf16.msra.mxu0 %v3058_v47 }
 0x35b   :  { %2272 = vmatprep.subr.bf16.mxu0 %v2829_v0 }
 0x35d   :  { %2253 = vmatpush3.bf16.msra.mxu1 %v2966_v10 }
 0x35e   :  { %2278 = vmatprep.subr.bf16.mxu1 %v2829_v0  ;;  %2273 = vmatpush3.bf16.msra.mxu0 %v3070_v49 }
 0x35f   :  { %2298 = vmatprep.subr.bf16.mxu0 %v2829_v0 }
 0x360   :  { %2255 = vmatmul.mubr.bf16.vlgmr.msra.gmra.mxu1 %v566_v27 }
 0x361   :  { %2279 = vmatpush3.bf16.msra.mxu1 %v2981_v13  ;;  %2294 = vmatprep.mubr.msk.bf16.mxu1 %vm2830_vm0, %v2829_v0 }
 0x362   :  { %2280 = vmatprep.subr.bf16.mxu1 %v2829_v0 }
 0x365   :  { %2281 = vmatpush3.bf16.msra.mxu1 %v3002_v32 }
 0x366   :  { %2282 = vmatprep.subr.bf16.mxu1 %v2829_v0 }
 0x369   :  { %2283 = vmatpush3.bf16.msra.mxu1 %v3013_v34 }
 0x36a   :  { %2284 = vmatprep.subr.bf16.mxu1 %v2829_v0 }
 0x36d   :  { %2285 = vmatpush3.bf16.msra.mxu1 %v3026_v38 }
 0x36e   :  { %2286 = vmatprep.subr.bf16.mxu1 %v2829_v0 }
 0x371   :  { %2287 = vmatpush3.bf16.msra.mxu1 %v3040_v43 }
 0x372   :  { %2288 = vmatprep.subr.bf16.mxu1 %v2829_v0 }
 0x375   :  { %2289 = vmatpush3.bf16.msra.mxu1 %v3053_v46 }
 0x376   :  { %2290 = vmatprep.subr.bf16.mxu1 %v2829_v0 }
 0x379   :  { %2291 = vmatpush3.bf16.msra.mxu1 %v3065_v48 }
 0x37a   :  { %2292 = vmatprep.subr.bf16.mxu1 %v2829_v0 }
 0x37d   :  { %2293 = vmatpush3.bf16.msra.mxu1 %v3076_v50 }
 0x37e   :  { %2318 = vmatprep.subr.bf16.mxu1 %v2829_v0 }
 0x400   :  { %v602_v29 = vpop.f32.mrf.mxu1  ;;  %v642_v30 = vpop.f32.mrf.mxu0 }
 0x401   :  { %v603_v52 = vadd.f32 %v3148_v18, %v602_v29 }
 0x402   :  { %v2216_v31 = vpop.f32.mrf.mxu1  ;;  %v2236_v36 = vpop.f32.mrf.mxu0 }
 0x403   :  { %v648_v53 = vadd.f32 %v642_v30, %v603_v52 }
 0x404   :  { %v605_v39 = vpop.f32.mrf.mxu1  ;;  %v645_v42 = vpop.f32.mrf.mxu0 }
 0x405   :  { %v1863_v55 = vmul.f32 -1.442695, %v648_v53 }
 0x406   :  { %v2217_v45 = vpop.f32.mrf.mxu1  ;;  %v2237_v51 = vpop.f32.mrf.mxu0 }
 0x407   :  { %2679 = vpow2.f32 %v1863_v55 }
 0x414   :  { %v2680_v63 = vpop.eup %2679 }
 0x415   :  { %v652_v11 = vadd.f32 1.0, %v2680_v63 }
 0x420   :  { %v703_v54 = vpop.f32.mrf.mxu1 }
 0x421   :  { %v710_v56 = vrot.slane %v703_v54, 4 }
 0x422   :  { %v2256_v57 = vpop.f32.mrf.mxu1 }
 0x423   :  { %v712_v59 = vadd.f32 %v710_v56, %v2999_v21 }
 0x424   :  { %v706_v60 = vpop.f32.mrf.mxu1 }
 0x425   :  { %v1864_v61 = vmul.f32 -1.442695, %v712_v59 }
 0x426   :  { %v2257_v62 = vpop.f32.mrf.mxu1 }
 0x427   :  { %2681 = vpow2.f32 %v1864_v61 }
 0x434   :  { %v2682_v3 = vpop.eup %2681 }
 0x435   :  { %v716_v15 = vadd.f32 1.0, %v2682_v3 }
 0x437   :  { %2683 = vrcp.f32 %v716_v15 }
 0x438   :  { %2685 = vrcp.f32 %v652_v11 }
 0x444   :  { %v2684_v16 = vpop.eup %2683 }
 0x445   :  { %v719_v17 = vmul.f32 %v2684_v16, %v3021_v37  ;;  %v2686_v22 = vpop.eup %2685 }
 0x446   :  { %v655_v24 = vmul.f32 %v2686_v22, %v3021_v37 }
 0x447   :  { %v720_v23 = vadd.f32 %v719_v17, %v3029_v40 }
 0x448   :  { %v656_v25 = vadd.f32 %v655_v24, %v3029_v40 }
 0x449   :  { %v722_v58 = vrot.slane %v720_v23, 4 }
 0x44b   :  { %727 = vrot.lane.b32.xlu0 %v722_v58, %s2833_s19  ;;  %724 = vrot.lane.b32.xlu1 %v722_v58, %s2827_s20 }
 0x44f   :  { %729 = vrot.lane.b32.xlu1 %v722_v58, %s2832_s0  ;;  %657 = vrot.lane.b32.xlu0 %v656_v25, %s2827_s20 }
 0x453   :  { %660 = vrot.lane.b32.xlu1 %v656_v25, %s2833_s19  ;;  %662 = vrot.lane.b32.xlu0 %v656_v25, %s2832_s0 }
 0x4bd   :  { %v728_v26 = vpop.permute.xlu0 %727  ;;  %v725_v27 = vpop.permute.xlu1 %724 }
 0x4be   :  { %v726_v30 = vmul.f32 %v725_v27, %v3166_v5 }
 0x4c1   :  { %v730_v28 = vpop.permute.xlu1 %729  ;;  %v658_v29 = vpop.permute.xlu0 %657 }
 0x4c2   :  { %v731_v31 = vmul.f32 %v730_v28, %v728_v26  ;;  %v659_v45 = vmul.f32 %v658_v29, %v3169_v20 }
 0x4c4   :  { %v3239_v36 = vadd.f32 %v731_v31, %v726_v30 }
 0x4c5   :  { %v661_v39 = vpop.permute.xlu1 %660  ;;  %v663_v42 = vpop.permute.xlu0 %662 }
 0x4c6   :  { %2687 = vtanh.f32 %v3239_v36  ;;  %v664_v51 = vmul.f32 %v663_v42, %v661_v39 }
 0x4c8   :  { %v3243_v52 = vadd.f32 %v664_v51, %v659_v45 }
 0x4ca   :  { %2689 = vtanh.f32 %v3243_v52 }
 0x4d3   :  { %v2688_v53 = vpop.eup %2687 }
 0x4d4   :  { %v735_v54 = vrot.slane %v2688_v53, 4 }
 0x4d6   :  { %v737_v55 = vmul.f32 %v735_v54, %v720_v23 }
 0x4d7   :  { %v2690_v56 = vpop.eup %2689 }
 0x4d8   :  { %v738_v57 = vpack.c.bf16 %v737_v55, %v737_v55  ;;  %v667_v5 = vmul.f32 %v2690_v56, %v656_v25 }
 0x4da   :  { %v740_v59 = vrot.slane %v738_v57, 2  ;;  %v668_v60 = vpack.c.bf16 %v667_v5, %v667_v5 }
 0x4dc   :  { %2275 = vmatmul.mubr.bf16.vlgmr.msra.gmra.mxu0 %v740_v59  ;;  %2295 = vmatmul.mubr.bf16.vlgmr.msra.gmra.mxu1 %v668_v60 }
 0x4dd   :  { %2299 = vmatpush3.bf16.msra.mxu0 %v2909_v1  ;;  %2314 = vmatprep.mubr.msk.bf16.mxu0 %vm2830_vm0, %v2829_v0 }
 0x4de   :  { %2300 = vmatprep.subr.bf16.mxu0 %v2829_v0  ;;  %2319 = vmatpush3.bf16.msra.mxu1 %v2979_v12 }
 0x4df   :  { %2320 = vmatprep.subr.bf16.mxu1 %v2829_v0  ;;  %2334 = vmatprep.mubr.msk.bf16.mxu1 %vm2830_vm0, %v2829_v0 }
 0x4e1   :  { %2301 = vmatpush3.bf16.msra.mxu0 %v2915_v2 }
 0x4e2   :  { %2302 = vmatprep.subr.bf16.mxu0 %v2829_v0  ;;  %2321 = vmatpush3.bf16.msra.mxu1 %v2988_v14 }
 0x4e3   :  { %2322 = vmatprep.subr.bf16.mxu1 %v2829_v0 }
 0x4e5   :  { %2303 = vmatpush3.bf16.msra.mxu0 %v2925_v4 }
 0x4e6   :  { %2304 = vmatprep.subr.bf16.mxu0 %v2829_v0  ;;  %2323 = vmatpush3.bf16.msra.mxu1 %v3007_v33 }
 0x4e7   :  { %2324 = vmatprep.subr.bf16.mxu1 %v2829_v0 }
 0x4e9   :  { %2305 = vmatpush3.bf16.msra.mxu0 %v2936_v6 }
 0x4ea   :  { %2306 = vmatprep.subr.bf16.mxu0 %v2829_v0  ;;  %2325 = vmatpush3.bf16.msra.mxu1 %v3018_v35 }
 0x4eb   :  { %2326 = vmatprep.subr.bf16.mxu1 %v2829_v0 }
 0x4ed   :  { %2307 = vmatpush3.bf16.msra.mxu0 %v2944_v7 }
 0x4ee   :  { %2308 = vmatprep.subr.bf16.mxu0 %v2829_v0  ;;  %2327 = vmatpush3.bf16.msra.mxu1 %v3034_v41 }
 0x4ef   :  { %2328 = vmatprep.subr.bf16.mxu1 %v2829_v0 }
 0x4f1   :  { %2309 = vmatpush3.bf16.msra.mxu0 %v2951_v8 }
 0x4f2   :  { %2310 = vmatprep.subr.bf16.mxu0 %v2829_v0  ;;  %2329 = vmatpush3.bf16.msra.mxu1 %v3045_v44 }
 0x4f3   :  { %2330 = vmatprep.subr.bf16.mxu1 %v2829_v0 }
 0x4f5   :  { %2311 = vmatpush3.bf16.msra.mxu0 %v2958_v9 }
 0x4f6   :  { %2312 = vmatprep.subr.bf16.mxu0 %v2829_v0  ;;  %2331 = vmatpush3.bf16.msra.mxu1 %v3058_v47 }
 0x4f7   :  { %2332 = vmatprep.subr.bf16.mxu1 %v2829_v0 }
 0x4f9   :  { %2313 = vmatpush3.bf16.msra.mxu0 %v2966_v10 }
 0x4fa   :  { %2338 = vmatprep.subr.bf16.mxu0 %v2829_v0  ;;  %2333 = vmatpush3.bf16.msra.mxu1 %v3070_v49 }
 0x4fb   :  { %2358 = vmatprep.subr.bf16.mxu1 %v2829_v0 }
 0x4fc   :  { %2315 = vmatmul.mubr.bf16.vlgmr.msra.gmra.mxu0 %v740_v59 }
 0x4fd   :  { %2339 = vmatpush3.bf16.msra.mxu0 %v2981_v13  ;;  %2354 = vmatprep.mubr.msk.bf16.mxu0 %vm2830_vm0, %v2829_v0 }
 0x4fe   :  { %2340 = vmatprep.subr.bf16.mxu0 %v2829_v0 }
 0x501   :  { %2341 = vmatpush3.bf16.msra.mxu0 %v3002_v32 }
 0x502   :  { %2342 = vmatprep.subr.bf16.mxu0 %v2829_v0 }
 0x505   :  { %2343 = vmatpush3.bf16.msra.mxu0 %v3013_v34 }
 0x506   :  { %2344 = vmatprep.subr.bf16.mxu0 %v2829_v0 }
 0x509   :  { %2345 = vmatpush3.bf16.msra.mxu0 %v3026_v38 }
 0x50a   :  { %2346 = vmatprep.subr.bf16.mxu0 %v2829_v0 }
 0x50d   :  { %2347 = vmatpush3.bf16.msra.mxu0 %v3040_v43 }
 0x50e   :  { %2348 = vmatprep.subr.bf16.mxu0 %v2829_v0 }
 0x511   :  { %2349 = vmatpush3.bf16.msra.mxu0 %v3053_v46 }
 0x512   :  { %2350 = vmatprep.subr.bf16.mxu0 %v2829_v0 }
 0x515   :  { %2351 = vmatpush3.bf16.msra.mxu0 %v3065_v48 }
 0x516   :  { %2352 = vmatprep.subr.bf16.mxu0 %v2829_v0 }
 0x519   :  { %2353 = vmatpush3.bf16.msra.mxu0 %v3076_v50 }
 0x51a   :  { %2378 = vmatprep.subr.bf16.mxu0 %v2829_v0 }
 0x59c   :  { %v776_v1 = vpop.f32.mrf.mxu0  ;;  %v816_v2 = vpop.f32.mrf.mxu1 }
 0x59d   :  { %v777_v63 = vadd.f32 %v3148_v18, %v776_v1 }
 0x59e   :  { %v2276_v4 = vpop.f32.mrf.mxu0  ;;  %v2296_v6 = vpop.f32.mrf.mxu1 }
 0x59f   :  { %v822_v3 = vadd.f32 %v816_v2, %v777_v63 }
 0x5a0   :  { %v779_v7 = vpop.f32.mrf.mxu0  ;;  %v819_v20 = vpop.f32.mrf.mxu1 }
 0x5a1   :  { %v1865_v15 = vmul.f32 -1.442695, %v822_v3 }
 0x5a2   :  { %v2277_v61 = vpop.f32.mrf.mxu0  ;;  %v2297_v62 = vpop.f32.mrf.mxu1 }
 0x5a3   :  { %2691 = vpow2.f32 %v1865_v15  ;;  %v3354_v15 = vld [vmem:[%s3757_s2 + $0x20] sm:$0xff]  }
 0x5b0   :  { %v2692_v25 = vpop.eup %2691 }
 0x5b1   :  { %v826_v27 = vadd.f32 1.0, %v2692_v25 }
 0x5bc   :  { %v877_v11 = vpop.f32.mrf.mxu0 }
 0x5bd   :  { %v884_v16 = vrot.slane %v877_v11, 2  ;;  %v3336_v11 = vld [vmem:[%s3757_s2 + $0x30] sm:$0xff]  }
 0x5be   :  { %v2316_v17 = vpop.f32.mrf.mxu0 }
 0x5bf   :  { %v886_v22 = vadd.f32 %v884_v16, %v2999_v21 }
 0x5c0   :  { %v880_v23 = vpop.f32.mrf.mxu0 }
 0x5c1   :  { %v1866_v58 = vmul.f32 -1.442695, %v886_v22 }
 0x5c2   :  { %v2317_v24 = vpop.f32.mrf.mxu0 }
 0x5c3   :  { %2693 = vpow2.f32 %v1866_v58 }
 0x5d0   :  { %v2694_v26 = vpop.eup %2693 }
 0x5d1   :  { %v890_v28 = vadd.f32 1.0, %v2694_v26 }
 0x5d3   :  { %2695 = vrcp.f32 %v890_v28 }
 0x5d4   :  { %2697 = vrcp.f32 %v826_v27 }
 0x5e0   :  { %v2696_v29 = vpop.eup %2695 }
 0x5e1   :  { %v893_v30 = vmul.f32 %v2696_v29, %v3021_v37  ;;  %v2698_v31 = vpop.eup %2697 }
 0x5e2   :  { %v829_v21 = vmul.f32 %v2698_v31, %v3021_v37 }
 0x5e3   :  { %v894_v39 = vadd.f32 %v893_v30, %v3029_v40 }
 0x5e4   :  { %v830_v45 = vadd.f32 %v829_v21, %v3029_v40 }
 0x5e5   :  { %v896_v42 = vrot.slane %v894_v39, 6 }
 0x5e7   :  { %901 = vrot.lane.b32.xlu0 %v896_v42, %s2833_s19  ;;  %898 = vrot.lane.b32.xlu1 %v896_v42, %s2827_s20 }
 0x5eb   :  { %831 = vrot.lane.b32.xlu0 %v830_v45, %s2827_s20  ;;  %903 = vrot.lane.b32.xlu1 %v896_v42, %s2832_s0 }
 0x5ef   :  { %836 = vrot.lane.b32.xlu0 %v830_v45, %s2832_s0  ;;  %834 = vrot.lane.b32.xlu1 %v830_v45, %s2833_s19 }
 0x659   :  { %v902_v51 = vpop.permute.xlu0 %901  ;;  %v899_v53 = vpop.permute.xlu1 %898 }
 0x65a   :  { %v900_v56 = vmul.f32 %v899_v53, %v3239_v36 }
 0x65d   :  { %v832_v54 = vpop.permute.xlu0 %831  ;;  %v904_v55 = vpop.permute.xlu1 %903 }
 0x65e   :  { %v905_v57 = vmul.f32 %v904_v55, %v902_v51  ;;  %v833_v1 = vmul.f32 %v832_v54, %v3243_v52  ;;  %v3323_v52 = vld [vmem:[%s3757_s2 + $0x38] sm:$0xff]  }
 0x660   :  { %v3313_v5 = vadd.f32 %v905_v57, %v900_v56 }
 0x661   :  { %v837_v59 = vpop.permute.xlu0 %836  ;;  %v835_v60 = vpop.permute.xlu1 %834 }
 0x662   :  { %2699 = vtanh.f32 %v3313_v5  ;;  %v838_v2 = vmul.f32 %v837_v59, %v835_v60 }
 0x664   :  { %v3317_v4 = vadd.f32 %v838_v2, %v833_v1 }
 0x666   :  { %2701 = vtanh.f32 %v3317_v4 }
 0x66f   :  { %v2700_v6 = vpop.eup %2699 }
 0x670   :  { %v909_v7 = vrot.slane %v2700_v6, 2  ;;  %v3438_v6 = vld [vmem:[%s3759_s4 + $0x30] sm:$0xff]  }
 0x672   :  { %v911_v20 = vmul.f32 %v909_v7, %v894_v39  ;;  %v3447_v7 = vld [vmem:[%s3759_s4 + $0x28] sm:$0xff]  }
 0x673   :  { %v2702_v61 = vpop.eup %2701 }
 0x674   :  { %v912_v62 = vpack.c.bf16 %v911_v20, %v911_v20  ;;  %v841_v36 = vmul.f32 %v2702_v61, %v830_v45  ;;  %v3456_v20 = vld [vmem:[%s3759_s4 + $0x20] sm:$0xff]   ;;  %v3464_v61 = vld [vmem:[%s3757_s2 + $0x10] sm:$0xff]  }
 0x676   :  { %v914_v63 = vrot.slane %v912_v62, 3  ;;  %v842_v3 = vpack.c.bf16 %v841_v36, %v841_v36  ;;  %v3470_v62 = vld [vmem:[%s3759_s4 + $0x18] sm:$0xff]   ;;  %v3478_v36 = vld [vmem:[%s3757_s2 + $0x8] sm:$0xff]  }
 0x678   :  { %2335 = vmatmul.mubr.bf16.vlgmr.msra.gmra.mxu1 %v914_v63  ;;  %2355 = vmatmul.mubr.bf16.vlgmr.msra.gmra.mxu0 %v842_v3  ;;  %v3492_v3 = vld [vmem:[%s3757_s2] sm:$0xff]  }
 0x679   :  { %2359 = vmatpush3.bf16.msra.mxu1 %v3323_v52  ;;  %2374 = vmatprep.mubr.msk.bf16.mxu1 %vm2830_vm0, %v2829_v0 }
 0x67a   :  { %2360 = vmatprep.subr.bf16.mxu1 %v2829_v0  ;;  %2379 = vmatpush3.bf16.msra.mxu0 %v2979_v12  ;;  %v3345_v12 = vld [vmem:[%s3757_s2 + $0x28] sm:$0xff]  }
 0x67b   :  { %2380 = vmatprep.subr.bf16.mxu0 %v2829_v0  ;;  %2394 = vmatprep.mubr.msk.bf16.mxu0 %vm2830_vm0, %v2829_v0 }
 0x67d   :  { %2361 = vmatpush3.bf16.msra.mxu1 %v3336_v11 }
 0x67e   :  { %2362 = vmatprep.subr.bf16.mxu1 %v2829_v0  ;;  %2381 = vmatpush3.bf16.msra.mxu0 %v2988_v14  ;;  %v3363_v14 = vld [vmem:[%s3757_s2 + $0x18] sm:$0xff]  }
 0x67f   :  { %2382 = vmatprep.subr.bf16.mxu0 %v2829_v0 }
 0x681   :  { %2363 = vmatpush3.bf16.msra.mxu1 %v3345_v12 }
 0x682   :  { %2364 = vmatprep.subr.bf16.mxu1 %v2829_v0  ;;  %2383 = vmatpush3.bf16.msra.mxu0 %v3007_v33 }
 0x683   :  { %2384 = vmatprep.subr.bf16.mxu0 %v2829_v0 }
 0x685   :  { %2365 = vmatpush3.bf16.msra.mxu1 %v3354_v15 }
 0x686   :  { %2366 = vmatprep.subr.bf16.mxu1 %v2829_v0  ;;  %2385 = vmatpush3.bf16.msra.mxu0 %v3018_v35 }
 0x687   :  { %2386 = vmatprep.subr.bf16.mxu0 %v2829_v0 }
 0x689   :  { %2367 = vmatpush3.bf16.msra.mxu1 %v3363_v14 }
 0x68a   :  { %2368 = vmatprep.subr.bf16.mxu1 %v2829_v0  ;;  %2387 = vmatpush3.bf16.msra.mxu0 %v3034_v41 }
 0x68b   :  { %2388 = vmatprep.subr.bf16.mxu0 %v2829_v0 }
 0x68d   :  { %2369 = vmatpush3.bf16.msra.mxu1 %v2951_v8 }
 0x68e   :  { %2370 = vmatprep.subr.bf16.mxu1 %v2829_v0  ;;  %2389 = vmatpush3.bf16.msra.mxu0 %v3045_v44 }
 0x68f   :  { %2390 = vmatprep.subr.bf16.mxu0 %v2829_v0 }
 0x691   :  { %2371 = vmatpush3.bf16.msra.mxu1 %v2958_v9 }
 0x692   :  { %2372 = vmatprep.subr.bf16.mxu1 %v2829_v0  ;;  %2391 = vmatpush3.bf16.msra.mxu0 %v3058_v47 }
 0x693   :  { %2392 = vmatprep.subr.bf16.mxu0 %v2829_v0 }
 0x695   :  { %2373 = vmatpush3.bf16.msra.mxu1 %v2966_v10 }
 0x696   :  { %2398 = vmatprep.subr.bf16.mxu1 %v2829_v0  ;;  %2393 = vmatpush3.bf16.msra.mxu0 %v3070_v49 }
 0x697   :  { %2418 = vmatprep.subr.bf16.mxu0 %v2829_v0 }
 0x698   :  { %2375 = vmatmul.mubr.bf16.vlgmr.msra.gmra.mxu1 %v914_v63  ;;  %v3484_v63 = vld [vmem:[%s3759_s4 + $0x10] sm:$0xff]  }
 0x699   :  { %2399 = vmatpush3.bf16.msra.mxu1 %v2981_v13  ;;  %2414 = vmatprep.mubr.msk.bf16.mxu1 %vm2830_vm0, %v2829_v0 }
 0x69a   :  { %2400 = vmatprep.subr.bf16.mxu1 %v2829_v0 }
 0x69d   :  { %2401 = vmatpush3.bf16.msra.mxu1 %v3002_v32 }
 0x69e   :  { %2402 = vmatprep.subr.bf16.mxu1 %v2829_v0 }
 0x6a1   :  { %2403 = vmatpush3.bf16.msra.mxu1 %v3013_v34 }
 0x6a2   :  { %2404 = vmatprep.subr.bf16.mxu1 %v2829_v0 }
 0x6a5   :  { %2405 = vmatpush3.bf16.msra.mxu1 %v3026_v38 }
 0x6a6   :  { %2406 = vmatprep.subr.bf16.mxu1 %v2829_v0 }
 0x6a9   :  { %2407 = vmatpush3.bf16.msra.mxu1 %v3040_v43 }
 0x6aa   :  { %2408 = vmatprep.subr.bf16.mxu1 %v2829_v0 }
 0x6ad   :  { %2409 = vmatpush3.bf16.msra.mxu1 %v3053_v46 }
 0x6ae   :  { %2410 = vmatprep.subr.bf16.mxu1 %v2829_v0 }
 0x6b1   :  { %2411 = vmatpush3.bf16.msra.mxu1 %v3065_v48 }
 0x6b2   :  { %2412 = vmatprep.subr.bf16.mxu1 %v2829_v0 }
 0x6b5   :  { %2413 = vmatpush3.bf16.msra.mxu1 %v3076_v50 }
 0x6b6   :  { %2438 = vmatprep.subr.bf16.mxu1 %v2829_v0 }
 0x738   :  { %v950_v8 = vpop.f32.mrf.mxu1  ;;  %v990_v9 = vpop.f32.mrf.mxu0 }
 0x739   :  { %v951_v38 = vadd.f32 %v3148_v18, %v950_v8  ;;  %v3498_v8 = vld [vmem:[%s3759_s4 + $0x8] sm:$0xff]  }
 0x73a   :  { %v2336_v10 = vpop.f32.mrf.mxu1  ;;  %v2356_v13 = vpop.f32.mrf.mxu0 }
 0x73b   :  { %v996_v41 = vadd.f32 %v990_v9, %v951_v38  ;;  %v3503_v9 = vld [vmem:[#allocation2 + $0x38] sm:$0xff]   ;;  %v3509_v10 = vld [vmem:[%s3759_s4] sm:$0xff]   ;;  %v3516_v13 = vld [vmem:[#allocation2 + $0x30] sm:$0xff]  }
 0x73c   :  { %v953_v32 = vpop.f32.mrf.mxu1  ;;  %v993_v33 = vpop.f32.mrf.mxu0  ;;  %v3536_v38 = vld [vmem:[#allocation2 + $0x8] sm:$0xff]  }
 0x73d   :  { %v1867_v43 = vmul.f32 -1.442695, %v996_v41  ;;  %v3520_v32 = vld [vmem:[#allocation2 + $0x28] sm:$0xff]   ;;  %v3524_v33 = vld [vmem:[#allocation2 + $0x20] sm:$0xff]  }
 0x73e   :  { %v2337_v34 = vpop.f32.mrf.mxu1  ;;  %v2357_v35 = vpop.f32.mrf.mxu0  ;;  %v3540_v41 = vld [vmem:[#allocation2] sm:$0xff]  }
 0x73f   :  { %2703 = vpow2.f32 %v1867_v43  ;;  %v3528_v34 = vld [vmem:[#allocation2 + $0x18] sm:$0xff]   ;;  %v3532_v35 = vld [vmem:[#allocation2 + $0x10] sm:$0xff]  }
 0x74c   :  { %v2704_v16 = vpop.eup %2703 }
 0x74d   :  { %v1000_v17 = vadd.f32 1.0, %v2704_v16 }
 0x758   :  { %v1051_v44 = vpop.f32.mrf.mxu1 }
 0x759   :  { %v1057_v46 = vadd.f32 %v1051_v44, %v2997_v19 }
 0x75a   :  { %v2376_v47 = vpop.f32.mrf.mxu1 }
 0x75b   :  { %v1868_v48 = vmul.f32 -1.442695, %v1057_v46 }
 0x75c   :  { %v1054_v49 = vpop.f32.mrf.mxu1 }
 0x75d   :  { %2705 = vpow2.f32 %v1868_v48 }
 0x75e   :  { %v2377_v50 = vpop.f32.mrf.mxu1  ;;  %2707 = vrcp.f32 %v1000_v17 }
 0x76a   :  { %v2706_v22 = vpop.eup %2705 }
 0x76b   :  { %v1061_v23 = vadd.f32 1.0, %v2706_v22  ;;  %v2708_v58 = vpop.eup %2707 }
 0x76c   :  { %v1003_v27 = vmul.f32 %v2708_v58, %v3021_v37 }
 0x76d   :  { %2709 = vrcp.f32 %v1061_v23 }
 0x76e   :  { %v1004_v28 = vadd.f32 %v1003_v27, %v3029_v40 }
 0x77a   :  { %v2710_v24 = vpop.eup %2709 }
 0x77b   :  { %v1064_v25 = vmul.f32 %v2710_v24, %v3021_v37 }
 0x77d   :  { %v1065_v26 = vadd.f32 %v1064_v25, %v3029_v40 }
 0x77f   :  { %1069 = vrot.lane.b32.xlu0 %v1065_v26, %s2833_s19  ;;  %1066 = vrot.lane.b32.xlu1 %v1065_v26, %s2827_s20 }
 0x783   :  { %1071 = vrot.lane.b32.xlu1 %v1065_v26, %s2832_s0  ;;  %1005 = vrot.lane.b32.xlu0 %v1004_v28, %s2827_s20 }
 0x787   :  { %1008 = vrot.lane.b32.xlu1 %v1004_v28, %s2833_s19  ;;  %1010 = vrot.lane.b32.xlu0 %v1004_v28, %s2832_s0 }
 0x7f1   :  { %v1070_v29 = vpop.permute.xlu0 %1069  ;;  %v1067_v30 = vpop.permute.xlu1 %1066 }
 0x7f2   :  { %v1068_v42 = vmul.f32 %v1067_v30, %v3313_v5 }
 0x7f5   :  { %v1072_v31 = vpop.permute.xlu1 %1071  ;;  %v1006_v39 = vpop.permute.xlu0 %1005 }
 0x7f6   :  { %v1073_v21 = vmul.f32 %v1072_v31, %v1070_v29  ;;  %v1007_v54 = vmul.f32 %v1006_v39, %v3317_v4  ;;  %v3427_v4 = vld [vmem:[%s3759_s4 + $0x38] sm:$0xff]  }
 0x7f8   :  { %v3412_v45 = vadd.f32 %v1073_v21, %v1068_v42 }
 0x7f9   :  { %v1009_v51 = vpop.permute.xlu1 %1008  ;;  %v1011_v53 = vpop.permute.xlu0 %1010 }
 0x7fa   :  { %2711 = vtanh.f32 %v3412_v45  ;;  %v1012_v55 = vmul.f32 %v1011_v53, %v1009_v51 }
 0x7fc   :  { %v3416_v56 = vadd.f32 %v1012_v55, %v1007_v54 }
 0x7fe   :  { %2713 = vtanh.f32 %v3416_v56 }
 0x807   :  { %v2712_v57 = vpop.eup %2711 }
 0x808   :  { %v1076_v59 = vmul.f32 %v2712_v57, %v1065_v26 }
 0x80a   :  { %v1077_v60 = vpack.c.bf16 %v1076_v59, %v1076_v59 }
 0x80b   :  { %v2714_v1 = vpop.eup %2713 }
 0x80c   :  { %2395 = vmatmul.mubr.bf16.vlgmr.msra.gmra.mxu0 %v1077_v60  ;;  %v1015_v5 = vmul.f32 %v2714_v1, %v1004_v28 }
 0x80d   :  { %2419 = vmatpush3.bf16.msra.mxu0 %v3323_v52  ;;  %2434 = vmatprep.mubr.msk.bf16.mxu0 %vm2830_vm0, %v2829_v0 }
 0x80e   :  { %2420 = vmatprep.subr.bf16.mxu0 %v2829_v0  ;;  %v1016_v2 = vpack.c.bf16 %v1015_v5, %v1015_v5 }
 0x810   :  { %2415 = vmatmul.mubr.bf16.vlgmr.msra.gmra.mxu1 %v1016_v2 }
 0x811   :  { %2421 = vmatpush3.bf16.msra.mxu0 %v3336_v11  ;;  %2439 = vmatpush3.bf16.msra.mxu1 %v3427_v4 }
 0x812   :  { %2422 = vmatprep.subr.bf16.mxu0 %v2829_v0  ;;  %2440 = vmatprep.subr.bf16.mxu1 %v2829_v0 }
 0x813   :  { %2454 = vmatprep.mubr.msk.bf16.mxu1 %vm2830_vm0, %v2829_v0 }
 0x815   :  { %2423 = vmatpush3.bf16.msra.mxu0 %v3345_v12  ;;  %2441 = vmatpush3.bf16.msra.mxu1 %v3438_v6 }
 0x816   :  { %2424 = vmatprep.subr.bf16.mxu0 %v2829_v0  ;;  %2442 = vmatprep.subr.bf16.mxu1 %v2829_v0 }
 0x819   :  { %2425 = vmatpush3.bf16.msra.mxu0 %v3354_v15  ;;  %2443 = vmatpush3.bf16.msra.mxu1 %v3447_v7 }
 0x81a   :  { %2426 = vmatprep.subr.bf16.mxu0 %v2829_v0  ;;  %2444 = vmatprep.subr.bf16.mxu1 %v2829_v0 }
 0x81d   :  { %2427 = vmatpush3.bf16.msra.mxu0 %v3363_v14  ;;  %2445 = vmatpush3.bf16.msra.mxu1 %v3456_v20 }
 0x81e   :  { %2428 = vmatprep.subr.bf16.mxu0 %v2829_v0  ;;  %2446 = vmatprep.subr.bf16.mxu1 %v2829_v0 }
 0x821   :  { %2429 = vmatpush3.bf16.msra.mxu0 %v3464_v61  ;;  %2447 = vmatpush3.bf16.msra.mxu1 %v3470_v62 }
 0x822   :  { %2430 = vmatprep.subr.bf16.mxu0 %v2829_v0  ;;  %2448 = vmatprep.subr.bf16.mxu1 %v2829_v0 }
 0x825   :  { %2431 = vmatpush3.bf16.msra.mxu0 %v3478_v36  ;;  %2449 = vmatpush3.bf16.msra.mxu1 %v3484_v63 }
 0x826   :  { %2432 = vmatprep.subr.bf16.mxu0 %v2829_v0  ;;  %2450 = vmatprep.subr.bf16.mxu1 %v2829_v0 }
 0x829   :  { %2433 = vmatpush3.bf16.msra.mxu0 %v3492_v3  ;;  %2451 = vmatpush3.bf16.msra.mxu1 %v3498_v8 }
 0x82a   :  { %2458 = vmatprep.subr.bf16.mxu0 %v2829_v0  ;;  %2452 = vmatprep.subr.bf16.mxu1 %v2829_v0 }
 0x82c   :  { %2435 = vmatmul.mubr.bf16.vlgmr.msra.gmra.mxu0 %v1077_v60 }
 0x82d   :  { %2459 = vmatpush3.bf16.msra.mxu0 %v3503_v9  ;;  %2453 = vmatpush3.bf16.msra.mxu1 %v3509_v10 }
 0x82e   :  { %2460 = vmatprep.subr.bf16.mxu0 %v2829_v0  ;;  %2474 = vmatprep.mubr.msk.bf16.mxu0 %vm2830_vm0, %v2829_v0 }
 0x82f   :  { %2478 = vmatprep.subr.bf16.mxu1 %v2829_v0 }
 0x831   :  { %2461 = vmatpush3.bf16.msra.mxu0 %v3516_v13 }
 0x832   :  { %2462 = vmatprep.subr.bf16.mxu0 %v2829_v0 }
 0x835   :  { %2463 = vmatpush3.bf16.msra.mxu0 %v3520_v32 }
 0x836   :  { %2464 = vmatprep.subr.bf16.mxu0 %v2829_v0 }
 0x839   :  { %2465 = vmatpush3.bf16.msra.mxu0 %v3524_v33 }
 0x83a   :  { %2466 = vmatprep.subr.bf16.mxu0 %v2829_v0 }
 0x83d   :  { %2467 = vmatpush3.bf16.msra.mxu0 %v3528_v34 }
 0x83e   :  { %2468 = vmatprep.subr.bf16.mxu0 %v2829_v0 }
 0x841   :  { %2469 = vmatpush3.bf16.msra.mxu0 %v3532_v35 }
 0x842   :  { %2470 = vmatprep.subr.bf16.mxu0 %v2829_v0 }
 0x845   :  { %2471 = vmatpush3.bf16.msra.mxu0 %v3536_v38 }
 0x846   :  { %2472 = vmatprep.subr.bf16.mxu0 %v2829_v0 }
 0x849   :  { %2473 = vmatpush3.bf16.msra.mxu0 %v3540_v41 }
 0x84a   :  { %2498 = vmatprep.subr.bf16.mxu0 %v2829_v0 }
 0x8cc   :  { %v1112_v43 = vpop.f32.mrf.mxu0 }
 0x8cd   :  { %v1113_v17 = vadd.f32 %v3148_v18, %v1112_v43 }
 0x8ce   :  { %v2396_v44 = vpop.f32.mrf.mxu0 }
 0x8d0   :  { %v1115_v46 = vpop.f32.mrf.mxu0  ;;  %v1152_v47 = vpop.f32.mrf.mxu1 }
 0x8d1   :  { %v1158_v22 = vadd.f32 %v1152_v47, %v1113_v17 }
 0x8d2   :  { %v2397_v48 = vpop.f32.mrf.mxu0  ;;  %v2416_v49 = vpop.f32.mrf.mxu1 }
 0x8d3   :  { %v1869_v58 = vmul.f32 -1.442695, %v1158_v22 }
 0x8d4   :  { %v1155_v50 = vpop.f32.mrf.mxu1 }
 0x8d5   :  { %2715 = vpow2.f32 %v1869_v58 }
 0x8d6   :  { %v2417_v16 = vpop.f32.mrf.mxu1 }
 0x8e2   :  { %v2716_v30 = vpop.eup %2715 }
 0x8e3   :  { %v1162_v39 = vadd.f32 1.0, %v2716_v30 }
 0x8ec   :  { %v1213_v23 = vpop.f32.mrf.mxu0 }
 0x8ed   :  { %v1220_v24 = vrot.slane %v1213_v23, 6 }
 0x8ee   :  { %v2436_v25 = vpop.f32.mrf.mxu0 }
 0x8ef   :  { %v1222_v26 = vadd.f32 %v1220_v24, %v2997_v19 }
 0x8f0   :  { %v1216_v27 = vpop.f32.mrf.mxu0 }
 0x8f1   :  { %v1870_v28 = vmul.f32 -1.442695, %v1222_v26 }
 0x8f2   :  { %v2437_v29 = vpop.f32.mrf.mxu0 }
 0x8f3   :  { %2717 = vpow2.f32 %v1870_v28 }
 0x900   :  { %v2718_v31 = vpop.eup %2717 }
 0x901   :  { %v1226_v42 = vadd.f32 1.0, %v2718_v31 }
 0x903   :  { %2719 = vrcp.f32 %v1226_v42  ;;  %v3621_v42 = vld [vmem:[%s3761_s6] ss:$0 sm:$0xff] }
 0x904   :  { %2721 = vrcp.f32 %v1162_v39 }
 0x910   :  { %v2720_v21 = vpop.eup %2719 }
 0x911   :  { %v1229_v18 = vmul.f32 %v2720_v21, %v3021_v37  ;;  %v2722_v51 = vpop.eup %2721 }
 0x912   :  { %v1165_v55 = vmul.f32 %v2722_v51, %v3021_v37 }
 0x913   :  { %v1230_v53 = vadd.f32 %v1229_v18, %v3029_v40 }
 0x914   :  { %v1166_v57 = vadd.f32 %v1165_v55, %v3029_v40 }
 0x915   :  { %v1232_v54 = vrot.slane %v1230_v53, 2 }
 0x917   :  { %1237 = vrot.lane.b32.xlu0 %v1232_v54, %s2833_s19  ;;  %1234 = vrot.lane.b32.xlu1 %v1232_v54, %s2827_s20 }
 0x91b   :  { %1167 = vrot.lane.b32.xlu0 %v1166_v57, %s2827_s20  ;;  %1239 = vrot.lane.b32.xlu1 %v1232_v54, %s2832_s0 }
 0x91f   :  { %1172 = vrot.lane.b32.xlu0 %v1166_v57, %s2832_s0  ;;  %1170 = vrot.lane.b32.xlu1 %v1166_v57, %s2833_s19 }
 0x989   :  { %v1238_v59 = vpop.permute.xlu0 %1237  ;;  %v1235_v60 = vpop.permute.xlu1 %1234 }
 0x98a   :  { %v1236_v2 = vmul.f32 %v1235_v60, %v3412_v45 }
 0x98d   :  { %v1168_v1 = vpop.permute.xlu0 %1167  ;;  %v1240_v5 = vpop.permute.xlu1 %1239 }
 0x98e   :  { %v1241_v43 = vmul.f32 %v1240_v5, %v1238_v59  ;;  %v1169_v48 = vmul.f32 %v1168_v1, %v3416_v56 }
 0x990   :  { %v3557_v44 = vadd.f32 %v1241_v43, %v1236_v2 }
 0x991   :  { %v1173_v46 = vpop.permute.xlu0 %1172  ;;  %v1171_v47 = vpop.permute.xlu1 %1170 }
 0x992   :  { %2723 = vtanh.f32 %v3557_v44  ;;  %v1174_v49 = vmul.f32 %v1173_v46, %v1171_v47 }
 0x994   :  { %v3561_v50 = vadd.f32 %v1174_v49, %v1169_v48 }
 0x996   :  { %2725 = vtanh.f32 %v3561_v50 }
 0x99f   :  { %v2724_v16 = vpop.eup %2723 }
 0x9a0   :  { %v1245_v17 = vrot.slane %v2724_v16, 6 }
 0x9a2   :  { %v1247_v22 = vmul.f32 %v1245_v17, %v1230_v53 }
 0x9a3   :  { %v2726_v23 = vpop.eup %2725 }
 0x9a4   :  { %v1248_v58 = vpack.c.bf16 %v1247_v22, %v1247_v22  ;;  %v1177_v45 = vmul.f32 %v2726_v23, %v1166_v57 }
 0x9a6   :  { %v1250_v24 = vrot.slane %v1248_v58, 1  ;;  %v1178_v25 = vpack.c.bf16 %v1177_v45, %v1177_v45 }
 0x9a8   :  { %2455 = vmatmul.mubr.bf16.vlgmr.msra.gmra.mxu1 %v1250_v24  ;;  %2475 = vmatmul.mubr.bf16.vlgmr.msra.gmra.mxu0 %v1178_v25 }
 0x9a9   :  { %2479 = vmatpush3.bf16.msra.mxu1 %v3323_v52  ;;  %2494 = vmatprep.mubr.msk.bf16.mxu1 %vm2830_vm0, %v2829_v0 }
 0x9aa   :  { %2480 = vmatprep.subr.bf16.mxu1 %v2829_v0  ;;  %2499 = vmatpush3.bf16.msra.mxu0 %v3427_v4 }
 0x9ab   :  { %2500 = vmatprep.subr.bf16.mxu0 %v2829_v0  ;;  %2514 = vmatprep.mubr.msk.bf16.mxu0 %vm2830_vm0, %v2829_v0 }
 0x9ad   :  { %2481 = vmatpush3.bf16.msra.mxu1 %v3336_v11 }
 0x9ae   :  { %2482 = vmatprep.subr.bf16.mxu1 %v2829_v0  ;;  %2501 = vmatpush3.bf16.msra.mxu0 %v3438_v6 }
 0x9af   :  { %2502 = vmatprep.subr.bf16.mxu0 %v2829_v0 }
 0x9b1   :  { %2483 = vmatpush3.bf16.msra.mxu1 %v3345_v12 }
 0x9b2   :  { %2484 = vmatprep.subr.bf16.mxu1 %v2829_v0  ;;  %2503 = vmatpush3.bf16.msra.mxu0 %v3447_v7 }
 0x9b3   :  { %2504 = vmatprep.subr.bf16.mxu0 %v2829_v0 }
 0x9b5   :  { %2485 = vmatpush3.bf16.msra.mxu1 %v3354_v15 }
 0x9b6   :  { %2486 = vmatprep.subr.bf16.mxu1 %v2829_v0  ;;  %2505 = vmatpush3.bf16.msra.mxu0 %v3456_v20 }
 0x9b7   :  { %2506 = vmatprep.subr.bf16.mxu0 %v2829_v0 }
 0x9b9   :  { %2487 = vmatpush3.bf16.msra.mxu1 %v3363_v14 }
 0x9ba   :  { %2488 = vmatprep.subr.bf16.mxu1 %v2829_v0  ;;  %2507 = vmatpush3.bf16.msra.mxu0 %v3470_v62 }
 0x9bb   :  { %2508 = vmatprep.subr.bf16.mxu0 %v2829_v0 }
 0x9bd   :  { %2489 = vmatpush3.bf16.msra.mxu1 %v3464_v61 }
 0x9be   :  { %2490 = vmatprep.subr.bf16.mxu1 %v2829_v0  ;;  %2509 = vmatpush3.bf16.msra.mxu0 %v3484_v63 }
 0x9bf   :  { %2510 = vmatprep.subr.bf16.mxu0 %v2829_v0 }
 0x9c1   :  { %2491 = vmatpush3.bf16.msra.mxu1 %v3478_v36 }
 0x9c2   :  { %2492 = vmatprep.subr.bf16.mxu1 %v2829_v0  ;;  %2511 = vmatpush3.bf16.msra.mxu0 %v3498_v8 }
 0x9c3   :  { %2512 = vmatprep.subr.bf16.mxu0 %v2829_v0 }
 0x9c5   :  { %2493 = vmatpush3.bf16.msra.mxu1 %v3492_v3 }
 0x9c6   :  { %2518 = vmatprep.subr.bf16.mxu1 %v2829_v0  ;;  %2513 = vmatpush3.bf16.msra.mxu0 %v3509_v10 }
 0x9c7   :  { %2538 = vmatprep.subr.bf16.mxu0 %v2829_v0 }
 0x9c8   :  { %2495 = vmatmul.mubr.bf16.vlgmr.msra.gmra.mxu1 %v1250_v24 }
 0x9c9   :  { %2519 = vmatpush3.bf16.msra.mxu1 %v3503_v9  ;;  %2534 = vmatprep.mubr.msk.bf16.mxu1 %vm2830_vm0, %v2829_v0 }
 0x9ca   :  { %2520 = vmatprep.subr.bf16.mxu1 %v2829_v0 }
 0x9cd   :  { %2521 = vmatpush3.bf16.msra.mxu1 %v3516_v13 }
 0x9ce   :  { %2522 = vmatprep.subr.bf16.mxu1 %v2829_v0 }
 0x9d1   :  { %2523 = vmatpush3.bf16.msra.mxu1 %v3520_v32 }
 0x9d2   :  { %2524 = vmatprep.subr.bf16.mxu1 %v2829_v0 }
 0x9d5   :  { %2525 = vmatpush3.bf16.msra.mxu1 %v3524_v33 }
 0x9d6   :  { %2526 = vmatprep.subr.bf16.mxu1 %v2829_v0 }
 0x9d9   :  { %2527 = vmatpush3.bf16.msra.mxu1 %v3528_v34 }
 0x9da   :  { %2528 = vmatprep.subr.bf16.mxu1 %v2829_v0 }
 0x9dd   :  { %2529 = vmatpush3.bf16.msra.mxu1 %v3532_v35 }
 0x9de   :  { %2530 = vmatprep.subr.bf16.mxu1 %v2829_v0 }
 0x9e1   :  { %2531 = vmatpush3.bf16.msra.mxu1 %v3536_v38 }
 0x9e2   :  { %2532 = vmatprep.subr.bf16.mxu1 %v2829_v0 }
 0x9e5   :  { %2533 = vmatpush3.bf16.msra.mxu1 %v3540_v41 }
 0x9e6   :  { %2558 = vmatprep.subr.bf16.mxu1 %v2829_v0 }
 0xa68   :  { %v1286_v56 = vpop.f32.mrf.mxu1  ;;  %v1326_v26 = vpop.f32.mrf.mxu0 }
 0xa69   :  { %v1287_v21 = vadd.f32 %v3621_v42, %v1286_v56 }
 0xa6a   :  { %v2456_v27 = vpop.f32.mrf.mxu1  ;;  %v2476_v28 = vpop.f32.mrf.mxu0 }
 0xa6b   :  { %v1332_v18 = vadd.f32 %v1326_v26, %v1287_v21 }
 0xa6c   :  { %v1289_v29 = vpop.f32.mrf.mxu1  ;;  %v1329_v30 = vpop.f32.mrf.mxu0 }
 0xa6d   :  { %v1871_v53 = vmul.f32 -1.442695, %v1332_v18 }
 0xa6e   :  { %v2457_v31 = vpop.f32.mrf.mxu1  ;;  %v2477_v39 = vpop.f32.mrf.mxu0 }
 0xa6f   :  { %2727 = vpow2.f32 %v1871_v53 }
 0xa7c   :  { %v2728_v5 = vpop.eup %2727 }
 0xa7d   :  { %v1336_v43 = vadd.f32 1.0, %v2728_v5 }
 0xa88   :  { %v1387_v51 = vpop.f32.mrf.mxu1 }
 0xa89   :  { %v1394_v54 = vrot.slane %v1387_v51, 4 }
 0xa8a   :  { %v2496_v55 = vpop.f32.mrf.mxu1 }
 0xa8b   :  { %v1396_v57 = vadd.f32 %v1394_v54, %v2997_v19 }
 0xa8c   :  { %v1390_v59 = vpop.f32.mrf.mxu1 }
 0xa8d   :  { %v1872_v60 = vmul.f32 -1.442695, %v1396_v57 }
 0xa8e   :  { %v2497_v1 = vpop.f32.mrf.mxu1 }
 0xa8f   :  { %2729 = vpow2.f32 %v1872_v60 }
 0xa9c   :  { %v2730_v2 = vpop.eup %2729 }
 0xa9d   :  { %v1400_v46 = vadd.f32 1.0, %v2730_v2 }
 0xa9f   :  { %2731 = vrcp.f32 %v1400_v46 }
 0xaa0   :  { %2733 = vrcp.f32 %v1336_v43 }
 0xaac   :  { %v2732_v47 = vpop.eup %2731 }
 0xaad   :  { %v1403_v48 = vmul.f32 %v2732_v47, %v3021_v37  ;;  %v2734_v49 = vpop.eup %2733 }
 0xaae   :  { %v1339_v22 = vmul.f32 %v2734_v49, %v3021_v37 }
 0xaaf   :  { %v1404_v16 = vadd.f32 %v1403_v48, %v3029_v40 }
 0xab0   :  { %v1340_v23 = vadd.f32 %v1339_v22, %v3029_v40 }
 0xab1   :  { %v1406_v17 = vrot.slane %v1404_v16, 4 }
 0xab3   :  { %1411 = vrot.lane.b32.xlu0 %v1406_v17, %s2833_s19  ;;  %1408 = vrot.lane.b32.xlu1 %v1406_v17, %s2827_s20 }
 0xab7   :  { %1413 = vrot.lane.b32.xlu1 %v1406_v17, %s2832_s0  ;;  %1341 = vrot.lane.b32.xlu0 %v1340_v23, %s2827_s20 }
 0xabb   :  { %1344 = vrot.lane.b32.xlu1 %v1340_v23, %s2833_s19  ;;  %1346 = vrot.lane.b32.xlu0 %v1340_v23, %s2832_s0 }
 0xb25   :  { %v1412_v58 = vpop.permute.xlu0 %1411  ;;  %v1409_v45 = vpop.permute.xlu1 %1408 }
 0xb26   :  { %v1410_v56 = vmul.f32 %v1409_v45, %v3557_v44 }
 0xb29   :  { %v1414_v24 = vpop.permute.xlu1 %1413  ;;  %v1342_v25 = vpop.permute.xlu0 %1341 }
 0xb2a   :  { %v1415_v26 = vmul.f32 %v1414_v24, %v1412_v58  ;;  %v1343_v30 = vmul.f32 %v1342_v25, %v3561_v50 }
 0xb2c   :  { %v3636_v27 = vadd.f32 %v1415_v26, %v1410_v56 }
 0xb2d   :  { %v1345_v28 = vpop.permute.xlu1 %1344  ;;  %v1347_v29 = vpop.permute.xlu0 %1346 }
 0xb2e   :  { %2735 = vtanh.f32 %v3636_v27  ;;  %v1348_v31 = vmul.f32 %v1347_v29, %v1345_v28 }
 0xb30   :  { %v3640_v39 = vadd.f32 %v1348_v31, %v1343_v30  ;;  %v2654_v31 = vld [vmem:[%s3762_s7 + $0x30] sm:$0xff]  }
 0xb32   :  { %2737 = vtanh.f32 %v3640_v39 }
 0xb3b   :  { %v2736_v21 = vpop.eup %2735 }
 0xb3c   :  { %v1419_v18 = vrot.slane %v2736_v21, 4 }
 0xb3e   :  { %v1421_v51 = vmul.f32 %v1419_v18, %v1404_v16 }
 0xb3f   :  { %v2738_v53 = vpop.eup %2737 }
 0xb40   :  { %v1422_v54 = vpack.c.bf16 %v1421_v51, %v1421_v51  ;;  %v1351_v44 = vmul.f32 %v2738_v53, %v1340_v23 }
 0xb42   :  { %v1424_v55 = vrot.slane %v1422_v54, 2  ;;  %v1352_v57 = vpack.c.bf16 %v1351_v44, %v1351_v44 }
 0xb44   :  { %2515 = vmatmul.mubr.bf16.vlgmr.msra.gmra.mxu0 %v1424_v55  ;;  %2535 = vmatmul.mubr.bf16.vlgmr.msra.gmra.mxu1 %v1352_v57 }
 0xb45   :  { %2539 = vmatpush3.bf16.msra.mxu0 %v3323_v52  ;;  %2554 = vmatprep.mubr.msk.bf16.mxu0 %vm2830_vm0, %v2829_v0 }
 0xb46   :  { %2540 = vmatprep.subr.bf16.mxu0 %v2829_v0  ;;  %2559 = vmatpush3.bf16.msra.mxu1 %v3427_v4 }
 0xb47   :  { %2560 = vmatprep.subr.bf16.mxu1 %v2829_v0  ;;  %2574 = vmatprep.mubr.msk.bf16.mxu1 %vm2830_vm0, %v2829_v0 }
 0xb49   :  { %2541 = vmatpush3.bf16.msra.mxu0 %v3336_v11 }
 0xb4a   :  { %2542 = vmatprep.subr.bf16.mxu0 %v2829_v0  ;;  %2561 = vmatpush3.bf16.msra.mxu1 %v3438_v6 }
 0xb4b   :  { %2562 = vmatprep.subr.bf16.mxu1 %v2829_v0 }
 0xb4d   :  { %2543 = vmatpush3.bf16.msra.mxu0 %v3345_v12 }
 0xb4e   :  { %2544 = vmatprep.subr.bf16.mxu0 %v2829_v0  ;;  %2563 = vmatpush3.bf16.msra.mxu1 %v3447_v7 }
 0xb4f   :  { %2564 = vmatprep.subr.bf16.mxu1 %v2829_v0 }
 0xb51   :  { %2545 = vmatpush3.bf16.msra.mxu0 %v3354_v15 }
 0xb52   :  { %2546 = vmatprep.subr.bf16.mxu0 %v2829_v0  ;;  %2565 = vmatpush3.bf16.msra.mxu1 %v3456_v20 }
 0xb53   :  { %2566 = vmatprep.subr.bf16.mxu1 %v2829_v0 }
 0xb55   :  { %2547 = vmatpush3.bf16.msra.mxu0 %v3363_v14 }
 0xb56   :  { %2548 = vmatprep.subr.bf16.mxu0 %v2829_v0  ;;  %2567 = vmatpush3.bf16.msra.mxu1 %v3470_v62 }
 0xb57   :  { %2568 = vmatprep.subr.bf16.mxu1 %v2829_v0 }
 0xb59   :  { %2549 = vmatpush3.bf16.msra.mxu0 %v3464_v61 }
 0xb5a   :  { %2550 = vmatprep.subr.bf16.mxu0 %v2829_v0  ;;  %2569 = vmatpush3.bf16.msra.mxu1 %v3484_v63 }
 0xb5b   :  { %2570 = vmatprep.subr.bf16.mxu1 %v2829_v0 }
 0xb5d   :  { %2551 = vmatpush3.bf16.msra.mxu0 %v3478_v36 }
 0xb5e   :  { %2552 = vmatprep.subr.bf16.mxu0 %v2829_v0  ;;  %2571 = vmatpush3.bf16.msra.mxu1 %v3498_v8 }
 0xb5f   :  { %2572 = vmatprep.subr.bf16.mxu1 %v2829_v0 }
 0xb61   :  { %2553 = vmatpush3.bf16.msra.mxu0 %v3492_v3 }
 0xb62   :  { %2578 = vmatprep.subr.bf16.mxu0 %v2829_v0  ;;  %2573 = vmatpush3.bf16.msra.mxu1 %v3509_v10 }
 0xb63   :  { %2598 = vmatprep.subr.bf16.mxu1 %v2829_v0 }
 0xb64   :  { %2555 = vmatmul.mubr.bf16.vlgmr.msra.gmra.mxu0 %v1424_v55 }
 0xb65   :  { %2579 = vmatpush3.bf16.msra.mxu0 %v3503_v9  ;;  %2594 = vmatprep.mubr.msk.bf16.mxu0 %vm2830_vm0, %v2829_v0 }
 0xb66   :  { %2580 = vmatprep.subr.bf16.mxu0 %v2829_v0 }
 0xb69   :  { %2581 = vmatpush3.bf16.msra.mxu0 %v3516_v13 }
 0xb6a   :  { %2582 = vmatprep.subr.bf16.mxu0 %v2829_v0 }
 0xb6d   :  { %2583 = vmatpush3.bf16.msra.mxu0 %v3520_v32 }
 0xb6e   :  { %2584 = vmatprep.subr.bf16.mxu0 %v2829_v0 }
 0xb71   :  { %2585 = vmatpush3.bf16.msra.mxu0 %v3524_v33 }
 0xb72   :  { %2586 = vmatprep.subr.bf16.mxu0 %v2829_v0 }
 0xb75   :  { %2587 = vmatpush3.bf16.msra.mxu0 %v3528_v34 }
 0xb76   :  { %2588 = vmatprep.subr.bf16.mxu0 %v2829_v0 }
 0xb79   :  { %2589 = vmatpush3.bf16.msra.mxu0 %v3532_v35 }
 0xb7a   :  { %2590 = vmatprep.subr.bf16.mxu0 %v2829_v0 }
 0xb7d   :  { %2591 = vmatpush3.bf16.msra.mxu0 %v3536_v38 }
 0xb7e   :  { %2592 = vmatprep.subr.bf16.mxu0 %v2829_v0 }
 0xb81   :  { %2593 = vmatpush3.bf16.msra.mxu0 %v3540_v41 }
 0xc04   :  { %v1460_v52 = vpop.f32.mrf.mxu0  ;;  %v1500_v11 = vpop.f32.mrf.mxu1 }
 0xc05   :  { %v1461_v20 = vadd.f32 %v3621_v42, %v1460_v52 }
 0xc06   :  { %v2516_v12 = vpop.f32.mrf.mxu0  ;;  %v2536_v15 = vpop.f32.mrf.mxu1 }
 0xc07   :  { %v1506_v61 = vadd.f32 %v1500_v11, %v1461_v20 }
 0xc08   :  { %v1463_v14 = vpop.f32.mrf.mxu0  ;;  %v1503_v4 = vpop.f32.mrf.mxu1 }
 0xc09   :  { %v1873_v36 = vmul.f32 -1.442695, %v1506_v61  ;;  %v2655_v14 = vld [vmem:[%s3762_s7 + $0x28] sm:$0xff]   ;;  %v2658_v61 = vld [vmem:[%s3762_s7 + $0x10] sm:$0xff]  }
 0xc0a   :  { %v2517_v6 = vpop.f32.mrf.mxu0  ;;  %v2537_v7 = vpop.f32.mrf.mxu1 }
 0xc0b   :  { %2739 = vpow2.f32 %v1873_v36  ;;  %v2657_v6 = vld [vmem:[%s3762_s7 + $0x18] sm:$0xff]  }
 0xc18   :  { %v2740_v32 = vpop.eup %2739 }
 0xc19   :  { %v1510_v34 = vadd.f32 1.0, %v2740_v32 }
 0xc24   :  { %v1561_v62 = vpop.f32.mrf.mxu0 }
 0xc25   :  { %v1568_v63 = vrot.slane %v1561_v62, 2  ;;  %v2659_v62 = vld [vmem:[%s3762_s7 + $0x8] sm:$0xff]  }
 0xc26   :  { %v2556_v3 = vpop.f32.mrf.mxu0 }
 0xc27   :  { %v1570_v8 = vadd.f32 %v1568_v63, %v2997_v19 }
 0xc28   :  { %v1564_v9 = vpop.f32.mrf.mxu0 }
 0xc29   :  { %v1874_v10 = vmul.f32 -1.442695, %v1570_v8 }
 0xc2a   :  { %v2557_v13 = vpop.f32.mrf.mxu0 }
 0xc2b   :  { %2741 = vpow2.f32 %v1874_v10 }
 0xc38   :  { %v2742_v33 = vpop.eup %2741 }
 0xc39   :  { %v1574_v35 = vadd.f32 1.0, %v2742_v33  ;;  %v1876_v33 = vld [vmem:[%s3763_s8] ss:$0 sm:$0xff] }
 0xc3b   :  { %2743 = vrcp.f32 %v1574_v35 }
 0xc3c   :  { %2745 = vrcp.f32 %v1510_v34 }
 0xc48   :  { %v2744_v38 = vpop.eup %2743 }
 0xc49   :  { %v1577_v41 = vmul.f32 %v2744_v38, %v3021_v37  ;;  %v2746_v50 = vpop.eup %2745 }
 0xc4a   :  { %v1513_v19 = vmul.f32 %v2746_v50, %v3021_v37 }
 0xc4b   :  { %v1578_v59 = vadd.f32 %v1577_v41, %v3029_v40 }
 0xc4c   :  { %v1514_v1 = vadd.f32 %v1513_v19, %v3029_v40 }
 0xc4d   :  { %v1580_v60 = vrot.slane %v1578_v59, 6 }
 0xc4f   :  { %1585 = vrot.lane.b32.xlu0 %v1580_v60, %s2833_s19  ;;  %1582 = vrot.lane.b32.xlu1 %v1580_v60, %s2827_s20 }
 0xc53   :  { %1515 = vrot.lane.b32.xlu0 %v1514_v1, %s2827_s20  ;;  %1587 = vrot.lane.b32.xlu1 %v1580_v60, %s2832_s0 }
 0xc57   :  { %1520 = vrot.lane.b32.xlu0 %v1514_v1, %s2832_s0  ;;  %1518 = vrot.lane.b32.xlu1 %v1514_v1, %s2833_s19 }
 0xcc1   :  { %v1586_v5 = vpop.permute.xlu0 %1585  ;;  %v1583_v2 = vpop.permute.xlu1 %1582 }
 0xcc2   :  { %v1584_v47 = vmul.f32 %v1583_v2, %v3636_v27  ;;  %v2653_v27 = vld [vmem:[%s3762_s7 + $0x38] sm:$0xff]  }
 0xcc5   :  { %v1516_v43 = vpop.permute.xlu0 %1515  ;;  %v1588_v46 = vpop.permute.xlu1 %1587 }
 0xcc6   :  { %v1589_v48 = vmul.f32 %v1588_v46, %v1586_v5  ;;  %v1517_v22 = vmul.f32 %v1516_v43, %v3640_v39 }
 0xcc8   :  { %v1590_v49 = vadd.f32 %v1589_v48, %v1584_v47 }
 0xcc9   :  { %v1521_v16 = vpop.permute.xlu0 %1520  ;;  %v1519_v17 = vpop.permute.xlu1 %1518 }
 0xcca   :  { %2747 = vtanh.f32 %v1590_v49  ;;  %v1522_v23 = vmul.f32 %v1521_v16, %v1519_v17 }
 0xccc   :  { %v1523_v58 = vadd.f32 %v1522_v23, %v1517_v22 }
 0xcce   :  { %2749 = vtanh.f32 %v1523_v58 }
 0xcd7   :  { %v2748_v45 = vpop.eup %2747 }
 0xcd8   :  { %v1593_v24 = vrot.slane %v2748_v45, 2 }
 0xcda   :  { %v1595_v25 = vmul.f32 %v1593_v24, %v1578_v59 }
 0xcdb   :  { %v2750_v56 = vpop.eup %2749 }
 0xcdc   :  { %v1596_v26 = vpack.c.bf16 %v1595_v25, %v1595_v25  ;;  %v1525_v28 = vmul.f32 %v2750_v56, %v1514_v1 }
 0xcde   :  { %v1598_v29 = vrot.slane %v1596_v26, 3  ;;  %v1526_v30 = vpack.c.bf16 %v1525_v28, %v1525_v28 }
 0xce0   :  { %2575 = vmatmul.mubr.bf16.vlgmr.msra.gmra.mxu1 %v1598_v29  ;;  %2595 = vmatmul.mubr.bf16.vlgmr.msra.gmra.mxu0 %v1526_v30 }
 0xce1   :  { %2614 = vmatprep.mubr.msk.bf16.mxu1 %vm2830_vm0, %v2829_v0  ;;  %2599 = vmatpush3.bf16.msra.mxu1 %v2653_v27 }
 0xce2   :  { %2600 = vmatprep.subr.bf16.mxu1 %v2829_v0 }
 0xce5   :  { %2601 = vmatpush3.bf16.msra.mxu1 %v2654_v31 }
 0xce6   :  { %2602 = vmatprep.subr.bf16.mxu1 %v2829_v0 }
 0xce9   :  { %2603 = vmatpush3.bf16.msra.mxu1 %v2655_v14 }
 0xcea   :  { %2604 = vmatprep.subr.bf16.mxu1 %v2829_v0 }
 0xda0   :  { %v1634_v39 = vpop.f32.mrf.mxu1  ;;  %v1674_v21 = vpop.f32.mrf.mxu0 }
 0xda1   :  { %v1635_v18 = vadd.f32 %v3621_v42, %v1634_v39  ;;  %v2656_v42 = vld [vmem:[%s3762_s7 + $0x20] sm:$0xff]  }
 0xda2   :  { %v2576_v51 = vpop.f32.mrf.mxu1  ;;  %v2596_v53 = vpop.f32.mrf.mxu0  ;;  %2605 = vmatpush3.bf16.msra.mxu1 %v2656_v42 }
 0xda3   :  { %v1680_v54 = vadd.f32 %v1674_v21, %v1635_v18  ;;  %2606 = vmatprep.subr.bf16.mxu1 %v2829_v0 }
 0xda4   :  { %v1637_v44 = vpop.f32.mrf.mxu1  ;;  %v1677_v55 = vpop.f32.mrf.mxu0 }
 0xda5   :  { %v1875_v57 = vmul.f32 -1.442695, %v1680_v54 }
 0xda6   :  { %v2577_v52 = vpop.f32.mrf.mxu1  ;;  %v2597_v11 = vpop.f32.mrf.mxu0  ;;  %2607 = vmatpush3.bf16.msra.mxu1 %v2657_v6 }
 0xda7   :  { %2751 = vpow2.f32 %v1875_v57  ;;  %2608 = vmatprep.subr.bf16.mxu1 %v2829_v0 }
 0xdaa   :  { %2609 = vmatpush3.bf16.msra.mxu1 %v2658_v61 }
 0xdab   :  { %2610 = vmatprep.subr.bf16.mxu1 %v2829_v0 }
 0xdae   :  { %2611 = vmatpush3.bf16.msra.mxu1 %v2659_v62 }
 0xdaf   :  { %2612 = vmatprep.subr.bf16.mxu1 %v2829_v0 }
 0xdb4   :  { %v2752_v12 = vpop.eup %2751 }
 0xdb5   :  { %v1684_v15 = vadd.f32 1.0, %v2752_v12 }
 0xdb7   :  { %2753 = vrcp.f32 %v1684_v15 }
 0xdc4   :  { %v2754_v4 = vpop.eup %2753 }
 0xdc5   :  { %v1687_v7 = vmul.f32 %v2754_v4, %v3021_v37  ;;  %v2660_v37 = vld [vmem:[%s3762_s7] sm:$0xff]  }
 0xdc6   :  { %2613 = vmatpush3.bf16.msra.mxu1 %v2660_v37 }
 0xdc7   :  { %v1688_v20 = vadd.f32 %v1687_v7, %v3029_v40 }
 0xdc9   :  { %1692 = vrot.lane.b32.xlu0 %v1688_v20, %s2833_s19  ;;  %1689 = vrot.lane.b32.xlu1 %v1688_v20, %s2827_s20  ;;  %s2834_s19 = smov [#allocation5]  }
 0xdca   :  { %s1820_s7 = sshll.u32 %s2834_s19, 4  ;;  %s1821_s7 = int_to_ptr.vmem [resolvable:$true] %s1820_s7 }
 0xdcb   :  { %s2802_s30 = scalar_lea.vmem %s1821_s7, 32  ;;  %p2807_p6 = scmp.lt.s32.totalorder %s1821_s7, %s1821_s7 }
 0xdcc   :  { %p2803_p5 = scmp.ne.s32.totalorder %s1821_s7, %s2802_s30  ;;  %p2808_p7 = scmp.lt.s32.totalorder %s2802_s30, %s2802_s30 }
 0xdcd   :  { %1694 = vrot.lane.b32.xlu1 %v1688_v20, %s2832_s0 }
 0xdce   :  { %p2809_p8 = por %p2808_p7, %p2807_p6 }
 0xdd0   :  { %p2810_p9 = pnand %p2809_p8, %p2803_p5 }
 0xe3b   :  { %v1690_v40 = vpop.permute.xlu1 %1689  ;;  %v1693_v36 = vpop.permute.xlu0 %1692 }
 0xe3c   :  { %v1691_v3 = vmul.f32 %v1690_v40, %v1523_v58 }
 0xe3f   :  { %v1695_v63 = vpop.permute.xlu1 %1694 }
 0xe40   :  { %v1696_v8 = vmul.f32 %v1695_v63, %v1693_v36 }
 0xe42   :  { %v1697_v9 = vadd.f32 %v1696_v8, %v1691_v3 }
 0xe44   :  { %2755 = vtanh.f32 %v1697_v9 }
 0xe51   :  { %v2756_v10 = vpop.eup %2755 }
 0xe52   :  { %v1699_v13 = vmul.f32 %v2756_v10, %v1688_v20 }
 0xe54   :  { %v1700_v32 = vpack.c.bf16 %v1699_v13, %v1699_v13 }
 0xe56   :  { %2615 = vmatmul.mubr.bf16.vlgmr.msra.gmra.mxu1 %v1700_v32 }
 0xf16   :  { %v1806_v34 = vpop.f32.mrf.mxu1 }
 0xf17   :  { %v1807_v0 = vadd.f32 %v1876_v33, %v1806_v34 }
 0xf18   :  { %v2616_v35 = vpop.f32.mrf.mxu1 }
 0xf19   :  { %1813 = vst.msk [vmem:[#allocation5] sm:$0x3] %vm1812_vm5, %v1807_v0 }
 0xf1a   :  { %v1809_v38 = vpop.f32.mrf.mxu1 }
 0xf1b   :  { %2813 = shalt.err (!%p2810_p9)
}
 0xf1c   :  { %1823 = dma.vmem_to_hbm [thread:$0]  %s1821_s7, 32, %s3766_s11, [#allocation4]   ;;  %v2617_v41 = vpop.f32.mrf.mxu1 }
 0xf1d   :  { %2824 = dma.done.wait [#allocation4], 32  }
 0xf1e   :  { %2825 = vsyncadd [#allocation4], 4294967264 }
 0xf1f   :  { %1827 = vsyncpa [#allocation3], 1 }
 0xf20   :  { %1828 = vsyncpa [#allocation4], 1 }

</bundles_post_ra>
